<compile_context>
chip_gen: v6e
topology: v6e:2x2x1
jax: 0.10.0
libtpu: 0.0.40
codegen_flags: <defaults>
</compile_context>

<pallas_src>
import math
import functools

import jax
import jax.numpy as jnp
from jax.experimental import pallas as pl
from jax.experimental.pallas import tpu as pltpu


def fused_encoder_kernel(x_ref, ln_w_ref, ln_b_ref,
                         wq_ref, bq_ref, wk_ref, bk_ref, wv_ref, bv_ref,
                         wo_ref, bo_ref, w1_ref, b1_ref, w2_ref, b2_ref,
                         enc_ln_w_ref, enc_ln_b_ref, fc_w_ref, fc_b_ref,
                         o_ref, x_scr, ctx_scr, *, batch, seq, heads):
    layer = pl.program_id(1)
    n_layers = pl.num_programs(1)

    @pl.when(layer == 0)
    def _():
        # activation enters VMEM once per batch tile and stays resident
        x_scr[...] = x_ref[...]

    D = x_ref.shape[-1]
    dk = D // heads
    scale = 1.0 / math.sqrt(dk)

    x = x_scr[...]                              # (R, D) f32, R = batch * seq
    ln_w = ln_w_ref[...]                        # (1, D) f32 (shared 3x per layer)
    ln_b = ln_b_ref[...]

    def layernorm(v, w, b):                     # f32 elementwise math (v5e-safe)
        mu = jnp.mean(v, axis=-1, keepdims=True)
        var = jnp.mean(jnp.square(v - mu), axis=-1, keepdims=True)
        return (v - mu) * jax.lax.rsqrt(var + 1e-5) * w + b

    def dense(v, w_ref, b_ref):                 # bf16 MXU operands, f32 accumulation
        return (jnp.dot(v.astype(w_ref.dtype), w_ref[...],
                        preferred_element_type=jnp.float32) + b_ref[...])

    # ---------------- pre-norm self-attention ----------------
    z1 = layernorm(x, ln_w, ln_b)
    q = dense(z1, wq_ref, bq_ref) * scale       # fold 1/sqrt(dk) into q once
    k = dense(z1, wk_ref, bk_ref)
    v = dense(z1, wv_ref, bv_ref)

    def to_heads(t):                            # (R, D) -> (heads*batch, seq, dk) bf16
        parts = [t[b * seq:(b + 1) * seq, h * dk:(h + 1) * dk].reshape(1, seq, dk)
                 for h in range(heads) for b in range(batch)]
        return jnp.concatenate(parts, axis=0).astype(jnp.bfloat16)

    qh, kh, vh = to_heads(q), to_heads(k), to_heads(v)

    # one head-batched contraction for scores, one for attn.V
    s = jnp.einsum('gid,gjd->gij', qh, kh,
                   preferred_element_type=jnp.float32)          # (G, S, S) f32
    # reference uses nn.Softmax(dim=1): normalize over the QUERY axis i
    m = jnp.max(s, axis=1, keepdims=True)
    e = jnp.exp(s - m)
    attn = e * pl.reciprocal(jnp.sum(e, axis=1, keepdims=True), approx=True)
    oh = jnp.einsum('gij,gjd->gid', attn.astype(jnp.bfloat16), vh,
                    preferred_element_type=jnp.float32)         # (G, S, dk) f32

    # reassemble per-head context into the flat (R, D) layout so the output
    # projection is a single big matmul
    for h in range(heads):
        for b in range(batch):
            ctx_scr[b * seq:(b + 1) * seq, h * dk:(h + 1) * dk] = oh[h * batch + b]
    a = dense(ctx_scr[...], wo_ref, bo_ref)

    x1 = x + a                                  # dropout = identity (eval mode)
    z2 = layernorm(x1, ln_w, ln_b)

    # -------- feed-forward (reference adds FFN output to the normalized z2) --------
    h1 = jnp.maximum(dense(z2, w1_ref, b1_ref), 0.0)            # ReLU
    f = dense(h1, w2_ref, b2_ref)
    x_new = layernorm(z2 + f, ln_w, ln_b)
    x_scr[...] = x_new

    # -------- fused head on the last layer: encoder LayerNorm + fc1 --------
    @pl.when(layer == n_layers - 1)
    def _():
        z = layernorm(x_new, enc_ln_w_ref[...], enc_ln_b_ref[...])
        o_ref[...] = dense(z, fc_w_ref, fc_b_ref).astype(o_ref.dtype)
        # x[:, -1, :] is selected on the tiny (B, S, n_labels) logits in the
        # wrapper; the full (B, S, D) activation never leaves VMEM.


def positional_encoding(seq_len, d_model, max_len=5000):
    # mirrors the PyTorch buffer construction exactly (requires even d_model,
    # same as the reference)
    assert d_model % 2 == 0, "PositionalEncoding requires an even d_model"
    pos = jnp.arange(max_len, dtype=jnp.float32)[:, None]
    div = jnp.exp(jnp.arange(0, d_model, 2, dtype=jnp.float32)
                  * (-math.log(10000.0) / d_model))
    ang = pos * div
    pe = jnp.zeros((max_len, d_model), jnp.float32)
    pe = pe.at[:, 0::2].set(jnp.sin(ang))
    pe = pe.at[:, 1::2].set(jnp.cos(ang))
    return pe[:seq_len]


def transformer_forward(tokens, params, *, heads, num_batch_tiles=1):
    B, S = tokens.shape
    D = params['embedding'].shape[1]
    L = params['wq'].shape[0]
    n_labels = params['fc_w'].shape[1]
    assert B % num_batch_tiles == 0
    bt_rows = B // num_batch_tiles              # batch elements per grid tile
    R_t = bt_rows * S                           # flattened rows per grid tile

    # glue: embedding lookup + positional encoding, flatten rows (plain JAX)
    x = params['embedding'][tokens] + positional_encoding(S, D)[None, :, :]
    x = x.reshape(B * S, D).astype(jnp.float32)

    kern = functools.partial(fused_encoder_kernel,
                             batch=bt_rows, seq=S, heads=heads)

    def layer_spec(a):                          # stacked per-layer (L, m, n) param
        m, n = a.shape[1], a.shape[2]
        return pl.BlockSpec((None, m, n), lambda b, l: (l, 0, 0))

    def fixed_spec(a):                          # head params, fetched once
        nd = a.ndim
        return pl.BlockSpec(a.shape, lambda b, l: (0,) * nd)

    args = (x,
            params['ln_w'], params['ln_b'],
            params['wq'], params['bq'], params['wk'], params['bk'],
            params['wv'], params['bv'], params['wo'], params['bo'],
            params['w1'], params['b1'], params['w2'], params['b2'],
            params['enc_ln_w'], params['enc_ln_b'],
            params['fc_w'], params['fc_b'])

    in_specs = [pl.BlockSpec((R_t, D), lambda b, l: (b, 0))]
    in_specs += [layer_spec(a) for a in args[1:15]]
    in_specs += [fixed_spec(a) for a in args[15:]]

    grid_spec = pltpu.PrefetchScalarGridSpec(
        num_scalar_prefetch=0,
        grid=(num_batch_tiles, L),              # (parallel batch tiles, layers)
        in_specs=in_specs,
        out_specs=pl.BlockSpec((R_t, n_labels), lambda b, l: (b, 0)),
        scratch_shapes=[pltpu.VMEM((R_t, D), jnp.float32),   # resident activation
                        pltpu.VMEM((R_t, D), jnp.float32)],  # attention context
    )

    logits = pl.pallas_call(
        kern,
        out_shape=jax.ShapeDtypeStruct((B * S, n_labels), jnp.float32),
        grid_spec=grid_spec,
        compiler_params=pltpu.CompilerParams(
            dimension_semantics=("parallel", "arbitrary"),
            # explicit VMEM budget with headroom (fits v7x's 64 MiB physical)
            vmem_limit_bytes=48 * 1024 * 1024),
    )(*args)

    # reference returns fc1(encoder(x))[:, -1, :]
    return logits.reshape(B, S, n_labels)[:, -1, :]


def init_params(key, vocab, D, hidden, n_layers, n_labels):
    def normal(k, shape, scale):
        return scale * jax.random.normal(k, shape, jnp.float32)

    L = n_layers
    keys = jax.random.split(key, 15)
    emb = normal(keys[0], (vocab, D), 0.1).at[vocab - 1].set(0.0)   # padding_idx row
    bf16 = jnp.bfloat16
    return dict(
        embedding=emb,
        # per-layer params stacked along a leading layer axis; weights pre-
        # transposed to [in, out] and stored bf16 for the MXU / smaller DMAs
        ln_w=jnp.ones((L, 1, D), jnp.float32),
        ln_b=jnp.zeros((L, 1, D), jnp.float32),
        wq=normal(keys[1], (L, D, D), 0.05).astype(bf16),
        bq=normal(keys[2], (L, 1, D), 0.02),
        wk=normal(keys[3], (L, D, D), 0.05).astype(bf16),
        bk=normal(keys[4], (L, 1, D), 0.02),
        wv=normal(keys[5], (L, D, D), 0.05).astype(bf16),
        bv=normal(keys[6], (L, 1, D), 0.02),
        wo=normal(keys[7], (L, D, D), 0.05).astype(bf16),
        bo=normal(keys[8], (L, 1, D), 0.02),
        w1=normal(keys[9], (L, D, hidden), 0.05).astype(bf16),
        b1=normal(keys[10], (L, 1, hidden), 0.02),
        w2=normal(keys[11], (L, hidden, D), 0.05).astype(bf16),
        b2=normal(keys[12], (L, 1, D), 0.02),
        enc_ln_w=jnp.ones((1, D), jnp.float32),
        enc_ln_b=jnp.zeros((1, D), jnp.float32),
        fc_w=normal(keys[13], (D, n_labels), 0.05),
        fc_b=normal(keys[14], (1, n_labels), 0.02),
    )


if __name__ == "__main__":
    key = jax.random.PRNGKey(0)
    B, S = 2, 8
    vocab, D, heads, hidden, n_layers, n_labels = 50, 32, 4, 64, 2, 4

    pkey, tkey = jax.random.split(key)
    params = init_params(pkey, vocab, D, hidden, n_layers, n_labels)
    tokens = jax.random.randint(tkey, (B, S), 0, vocab, dtype=jnp.int32)

    # num_batch_tiles=1 keeps one big lane-dense row block; set 2 on v7x to
    # give both TensorCores a parallel grid step.
    fwd = jax.jit(functools.partial(transformer_forward, heads=heads,
                                    num_batch_tiles=1))
    out = jax.block_until_ready(fwd(tokens, params))
    assert out.shape == (B, n_labels), out.shape
    print("KERNEL_OK")
</pallas_src>

<mosaic_0001>
module attributes {stable_mosaic.version = 11 : i64} {
  func.func @fused_encoder_kernel(%arg0: i32, %arg1: i32, %arg2: memref<16x32xf32, #tpu.memory_space<vmem>>, %arg3: memref<1x1x32xf32, #tpu.memory_space<vmem>>, %arg4: memref<1x1x32xf32, #tpu.memory_space<vmem>>, %arg5: memref<1x32x32xbf16, #tpu.memory_space<vmem>>, %arg6: memref<1x1x32xf32, #tpu.memory_space<vmem>>, %arg7: memref<1x32x32xbf16, #tpu.memory_space<vmem>>, %arg8: memref<1x1x32xf32, #tpu.memory_space<vmem>>, %arg9: memref<1x32x32xbf16, #tpu.memory_space<vmem>>, %arg10: memref<1x1x32xf32, #tpu.memory_space<vmem>>, %arg11: memref<1x32x32xbf16, #tpu.memory_space<vmem>>, %arg12: memref<1x1x32xf32, #tpu.memory_space<vmem>>, %arg13: memref<1x32x64xbf16, #tpu.memory_space<vmem>>, %arg14: memref<1x1x64xf32, #tpu.memory_space<vmem>>, %arg15: memref<1x64x32xbf16, #tpu.memory_space<vmem>>, %arg16: memref<1x1x32xf32, #tpu.memory_space<vmem>>, %arg17: memref<1x32xf32, #tpu.memory_space<vmem>>, %arg18: memref<1x32xf32, #tpu.memory_space<vmem>>, %arg19: memref<32x4xf32, #tpu.memory_space<vmem>>, %arg20: memref<1x4xf32, #tpu.memory_space<vmem>>, %arg21: memref<16x4xf32, #tpu.memory_space<vmem>>, %arg22: memref<16x32xf32, #tpu.memory_space<vmem>>, %arg23: memref<16x32xf32, #tpu.memory_space<vmem>>) attributes {dimension_semantics = [#tpu.dimension_semantics<parallel>, #tpu.dimension_semantics<arbitrary>], iteration_bounds = array<i64: 1, 2>, scalar_prefetch = 0 : i64, scratch_operands = 2 : i64, tpu.core_type = #tpu.core_type<tc>, window_params = [{transform_indices = @transform_0, window_bounds = array<i64: 16, 32>}, {transform_indices = @transform_1, window_bounds = array<i64: 1, 1, 32>}, {transform_indices = @transform_2, window_bounds = array<i64: 1, 1, 32>}, {transform_indices = @transform_3, window_bounds = array<i64: 1, 32, 32>}, {transform_indices = @transform_4, window_bounds = array<i64: 1, 1, 32>}, {transform_indices = @transform_5, window_bounds = array<i64: 1, 32, 32>}, {transform_indices = @transform_6, window_bounds = array<i64: 1, 1, 32>}, {transform_indices = @transform_7, window_bounds = array<i64: 1, 32, 32>}, {transform_indices = @transform_8, window_bounds = array<i64: 1, 1, 32>}, {transform_indices = @transform_9, window_bounds = array<i64: 1, 32, 32>}, {transform_indices = @transform_10, window_bounds = array<i64: 1, 1, 32>}, {transform_indices = @transform_11, window_bounds = array<i64: 1, 32, 64>}, {transform_indices = @transform_12, window_bounds = array<i64: 1, 1, 64>}, {transform_indices = @transform_13, window_bounds = array<i64: 1, 64, 32>}, {transform_indices = @transform_14, window_bounds = array<i64: 1, 1, 32>}, {pipeline_mode = #tpu.pipeline_mode<synchronous>, transform_indices = @transform_15, window_bounds = array<i64: 1, 32>}, {pipeline_mode = #tpu.pipeline_mode<synchronous>, transform_indices = @transform_16, window_bounds = array<i64: 1, 32>}, {pipeline_mode = #tpu.pipeline_mode<synchronous>, transform_indices = @transform_17, window_bounds = array<i64: 32, 4>}, {pipeline_mode = #tpu.pipeline_mode<synchronous>, transform_indices = @transform_18, window_bounds = array<i64: 1, 4>}, {transform_indices = @transform_19, window_bounds = array<i64: 16, 4>}]} {
    %c0_i32 = arith.constant 0 : i32
    %0 = arith.cmpi eq, %arg1, %c0_i32 : i32
    %1 = arith.extui %0 : i1 to i32
    %c0_i32_0 = arith.constant 0 : i32
    %2 = arith.cmpi ne, %1, %c0_i32_0 : i32
    scf.if %2 {
      %c0_88 = arith.constant 0 : index
      %c0_89 = arith.constant 0 : index
      %224 = vector.load %arg2[%c0_88, %c0_89] : memref<16x32xf32, #tpu.memory_space<vmem>>, vector<16x32xf32>
      %c0_90 = arith.constant 0 : index
      %c0_91 = arith.constant 0 : index
      %225 = vector.load %arg22[%c0_90, %c0_91] : memref<16x32xf32, #tpu.memory_space<vmem>>, vector<16x32xf32>
      tpu.vector_store %arg22[%c0_90, %c0_91], %224 {strides = array<i32>} : memref<16x32xf32, #tpu.memory_space<vmem>>, vector<16x32xf32>,
    } else {
    }
    %c0 = arith.constant 0 : index
    %c0_1 = arith.constant 0 : index
    %3 = vector.load %arg22[%c0, %c0_1] : memref<16x32xf32, #tpu.memory_space<vmem>>, vector<16x32xf32>
    %c0_2 = arith.constant 0 : index
    %c0_3 = arith.constant 0 : index
    %c0_4 = arith.constant 0 : index
    %4 = vector.load %arg3[%c0_2, %c0_3, %c0_4] : memref<1x1x32xf32, #tpu.memory_space<vmem>>, vector<1x1x32xf32>
    %5 = vector.shape_cast %4 : vector<1x1x32xf32> to vector<1x32xf32>
    %c0_5 = arith.constant 0 : index
    %c0_6 = arith.constant 0 : index
    %c0_7 = arith.constant 0 : index
    %6 = vector.load %arg4[%c0_5, %c0_6, %c0_7] : memref<1x1x32xf32, #tpu.memory_space<vmem>>, vector<1x1x32xf32>
    %7 = vector.shape_cast %6 : vector<1x1x32xf32> to vector<1x32xf32>
    %cst = arith.constant dense<0.000000e+00> : vector<16xf32>
    %8 = vector.multi_reduction <add>, %3, %cst [1] : vector<16x32xf32> to vector<16xf32>
    %9 = vector.shape_cast %8 : vector<16xf32> to vector<16x1xf32>
    %cst_8 = arith.constant 3.200000e+01 : f32
    %10 = vector.broadcast %cst_8 : f32 to vector<16x1xf32>
    %11 = arith.divf %9, %10 : vector<16x1xf32>
    %12 = vector.broadcast %11 : vector<16x1xf32> to vector<16x32xf32>
    %13 = arith.subf %3, %12 : vector<16x32xf32>
    %14 = arith.mulf %13, %13 : vector<16x32xf32>
    %cst_9 = arith.constant dense<0.000000e+00> : vector<16xf32>
    %15 = vector.multi_reduction <add>, %14, %cst_9 [1] : vector<16x32xf32> to vector<16xf32>
    %16 = vector.shape_cast %15 : vector<16xf32> to vector<16x1xf32>
    %cst_10 = arith.constant 3.200000e+01 : f32
    %17 = vector.broadcast %cst_10 : f32 to vector<16x1xf32>
    %18 = arith.divf %16, %17 : vector<16x1xf32>
    %19 = vector.broadcast %11 : vector<16x1xf32> to vector<16x32xf32>
    %20 = arith.subf %3, %19 : vector<16x32xf32>
    %cst_11 = arith.constant 9.99999974E-6 : f32
    %21 = vector.broadcast %cst_11 : f32 to vector<16x1xf32>
    %22 = arith.addf %18, %21 : vector<16x1xf32>
    %23 = math.rsqrt %22 : vector<16x1xf32>
    %24 = vector.broadcast %23 : vector<16x1xf32> to vector<16x32xf32>
    %25 = arith.mulf %20, %24 : vector<16x32xf32>
    %26 = vector.broadcast %5 : vector<1x32xf32> to vector<16x32xf32>
    %27 = arith.mulf %25, %26 : vector<16x32xf32>
    %28 = vector.broadcast %7 : vector<1x32xf32> to vector<16x32xf32>
    %29 = arith.addf %27, %28 : vector<16x32xf32>
    %30 = arith.truncf %29 : vector<16x32xf32> to vector<16x32xbf16>
    %c0_12 = arith.constant 0 : index
    %c0_13 = arith.constant 0 : index
    %c0_14 = arith.constant 0 : index
    %31 = vector.load %arg5[%c0_12, %c0_13, %c0_14] : memref<1x32x32xbf16, #tpu.memory_space<vmem>>, vector<1x32x32xbf16>
    %32 = vector.shape_cast %31 : vector<1x32x32xbf16> to vector<32x32xbf16>
    %cst_15 = arith.constant dense<0.000000e+00> : vector<16x32xf32>
    %33 = tpu.matmul %30, %32, %cst_15 {dimension_numbers = #tpu.dot_dimension_numbers<[1], [0], [0], [1], [0, 0, 1, 1], [], []>} : vector<16x32xbf16>, vector<32x32xbf16>, vector<16x32xf32> -> vector<16x32xf32>
    %c0_16 = arith.constant 0 : index
    %c0_17 = arith.constant 0 : index
    %c0_18 = arith.constant 0 : index
    %34 = vector.load %arg6[%c0_16, %c0_17, %c0_18] : memref<1x1x32xf32, #tpu.memory_space<vmem>>, vector<1x1x32xf32>
    %35 = vector.shape_cast %34 : vector<1x1x32xf32> to vector<1x32xf32>
    %36 = vector.broadcast %35 : vector<1x32xf32> to vector<16x32xf32>
    %37 = arith.addf %33, %36 : vector<16x32xf32>
    %cst_19 = arith.constant 0.353553385 : f32
    %38 = vector.broadcast %cst_19 : f32 to vector<16x32xf32>
    %39 = arith.mulf %37, %38 : vector<16x32xf32>
    %40 = arith.truncf %29 : vector<16x32xf32> to vector<16x32xbf16>
    %c0_20 = arith.constant 0 : index
    %c0_21 = arith.constant 0 : index
    %c0_22 = arith.constant 0 : index
    %41 = vector.load %arg7[%c0_20, %c0_21, %c0_22] : memref<1x32x32xbf16, #tpu.memory_space<vmem>>, vector<1x32x32xbf16>
    %42 = vector.shape_cast %41 : vector<1x32x32xbf16> to vector<32x32xbf16>
    %cst_23 = arith.constant dense<0.000000e+00> : vector<16x32xf32>
    %43 = tpu.matmul %40, %42, %cst_23 {dimension_numbers = #tpu.dot_dimension_numbers<[1], [0], [0], [1], [0, 0, 1, 1], [], []>} : vector<16x32xbf16>, vector<32x32xbf16>, vector<16x32xf32> -> vector<16x32xf32>
    %c0_24 = arith.constant 0 : index
    %c0_25 = arith.constant 0 : index
    %c0_26 = arith.constant 0 : index
    %44 = vector.load %arg8[%c0_24, %c0_25, %c0_26] : memref<1x1x32xf32, #tpu.memory_space<vmem>>, vector<1x1x32xf32>
    %45 = vector.shape_cast %44 : vector<1x1x32xf32> to vector<1x32xf32>
    %46 = vector.broadcast %45 : vector<1x32xf32> to vector<16x32xf32>
    %47 = arith.addf %43, %46 : vector<16x32xf32>
    %48 = arith.truncf %29 : vector<16x32xf32> to vector<16x32xbf16>
    %c0_27 = arith.constant 0 : index
    %c0_28 = arith.constant 0 : index
    %c0_29 = arith.constant 0 : index
    %49 = vector.load %arg9[%c0_27, %c0_28, %c0_29] : memref<1x32x32xbf16, #tpu.memory_space<vmem>>, vector<1x32x32xbf16>
    %50 = vector.shape_cast %49 : vector<1x32x32xbf16> to vector<32x32xbf16>
    %cst_30 = arith.constant dense<0.000000e+00> : vector<16x32xf32>
    %51 = tpu.matmul %48, %50, %cst_30 {dimension_numbers = #tpu.dot_dimension_numbers<[1], [0], [0], [1], [0, 0, 1, 1], [], []>} : vector<16x32xbf16>, vector<32x32xbf16>, vector<16x32xf32> -> vector<16x32xf32>
    %c0_31 = arith.constant 0 : index
    %c0_32 = arith.constant 0 : index
    %c0_33 = arith.constant 0 : index
    %52 = vector.load %arg10[%c0_31, %c0_32, %c0_33] : memref<1x1x32xf32, #tpu.memory_space<vmem>>, vector<1x1x32xf32>
    %53 = vector.shape_cast %52 : vector<1x1x32xf32> to vector<1x32xf32>
    %54 = vector.broadcast %53 : vector<1x32xf32> to vector<16x32xf32>
    %55 = arith.addf %51, %54 : vector<16x32xf32>
    %56 = vector.extract_strided_slice %39 {offsets = [0, 0], sizes = [8, 8], strides = [1, 1]} : vector<16x32xf32> to vector<8x8xf32>
    %57 = vector.shape_cast %56 : vector<8x8xf32> to vector<1x8x8xf32>
    %58 = vector.extract_strided_slice %39 {offsets = [8, 0], sizes = [8, 8], strides = [1, 1]} : vector<16x32xf32> to vector<8x8xf32>
    %59 = vector.shape_cast %58 : vector<8x8xf32> to vector<1x8x8xf32>
    %60 = vector.extract_strided_slice %39 {offsets = [0, 8], sizes = [8, 8], strides = [1, 1]} : vector<16x32xf32> to vector<8x8xf32>
    %61 = vector.shape_cast %60 : vector<8x8xf32> to vector<1x8x8xf32>
    %62 = vector.extract_strided_slice %39 {offsets = [8, 8], sizes = [8, 8], strides = [1, 1]} : vector<16x32xf32> to vector<8x8xf32>
    %63 = vector.shape_cast %62 : vector<8x8xf32> to vector<1x8x8xf32>
    %64 = vector.extract_strided_slice %39 {offsets = [0, 16], sizes = [8, 8], strides = [1, 1]} : vector<16x32xf32> to vector<8x8xf32>
    %65 = vector.shape_cast %64 : vector<8x8xf32> to vector<1x8x8xf32>
    %66 = vector.extract_strided_slice %39 {offsets = [8, 16], sizes = [8, 8], strides = [1, 1]} : vector<16x32xf32> to vector<8x8xf32>
    %67 = vector.shape_cast %66 : vector<8x8xf32> to vector<1x8x8xf32>
    %68 = vector.extract_strided_slice %39 {offsets = [0, 24], sizes = [8, 8], strides = [1, 1]} : vector<16x32xf32> to vector<8x8xf32>
    %69 = vector.shape_cast %68 : vector<8x8xf32> to vector<1x8x8xf32>
    %70 = vector.extract_strided_slice %39 {offsets = [8, 24], sizes = [8, 8], strides = [1, 1]} : vector<16x32xf32> to vector<8x8xf32>
    %71 = vector.shape_cast %70 : vector<8x8xf32> to vector<1x8x8xf32>
    %72 = tpu.concatenate %57, %59, %61, %63, %65, %67, %69, %71 in 0 : vector<1x8x8xf32>, vector<1x8x8xf32>, vector<1x8x8xf32>, vector<1x8x8xf32>, vector<1x8x8xf32>, vector<1x8x8xf32>, vector<1x8x8xf32>, vector<1x8x8xf32> -> vector<8x8x8xf32>
    %73 = arith.truncf %72 : vector<8x8x8xf32> to vector<8x8x8xbf16>
    %74 = vector.extract_strided_slice %47 {offsets = [0, 0], sizes = [8, 8], strides = [1, 1]} : vector<16x32xf32> to vector<8x8xf32>
    %75 = vector.shape_cast %74 : vector<8x8xf32> to vector<1x8x8xf32>
    %76 = vector.extract_strided_slice %47 {offsets = [8, 0], sizes = [8, 8], strides = [1, 1]} : vector<16x32xf32> to vector<8x8xf32>
    %77 = vector.shape_cast %76 : vector<8x8xf32> to vector<1x8x8xf32>
    %78 = vector.extract_strided_slice %47 {offsets = [0, 8], sizes = [8, 8], strides = [1, 1]} : vector<16x32xf32> to vector<8x8xf32>
    %79 = vector.shape_cast %78 : vector<8x8xf32> to vector<1x8x8xf32>
    %80 = vector.extract_strided_slice %47 {offsets = [8, 8], sizes = [8, 8], strides = [1, 1]} : vector<16x32xf32> to vector<8x8xf32>
    %81 = vector.shape_cast %80 : vector<8x8xf32> to vector<1x8x8xf32>
    %82 = vector.extract_strided_slice %47 {offsets = [0, 16], sizes = [8, 8], strides = [1, 1]} : vector<16x32xf32> to vector<8x8xf32>
    %83 = vector.shape_cast %82 : vector<8x8xf32> to vector<1x8x8xf32>
    %84 = vector.extract_strided_slice %47 {offsets = [8, 16], sizes = [8, 8], strides = [1, 1]} : vector<16x32xf32> to vector<8x8xf32>
    %85 = vector.shape_cast %84 : vector<8x8xf32> to vector<1x8x8xf32>
    %86 = vector.extract_strided_slice %47 {offsets = [0, 24], sizes = [8, 8], strides = [1, 1]} : vector<16x32xf32> to vector<8x8xf32>
    %87 = vector.shape_cast %86 : vector<8x8xf32> to vector<1x8x8xf32>
    %88 = vector.extract_strided_slice %47 {offsets = [8, 24], sizes = [8, 8], strides = [1, 1]} : vector<16x32xf32> to vector<8x8xf32>
    %89 = vector.shape_cast %88 : vector<8x8xf32> to vector<1x8x8xf32>
    %90 = tpu.concatenate %75, %77, %79, %81, %83, %85, %87, %89 in 0 : vector<1x8x8xf32>, vector<1x8x8xf32>, vector<1x8x8xf32>, vector<1x8x8xf32>, vector<1x8x8xf32>, vector<1x8x8xf32>, vector<1x8x8xf32>, vector<1x8x8xf32> -> vector<8x8x8xf32>
    %91 = arith.truncf %90 : vector<8x8x8xf32> to vector<8x8x8xbf16>
    %92 = vector.extract_strided_slice %55 {offsets = [0, 0], sizes = [8, 8], strides = [1, 1]} : vector<16x32xf32> to vector<8x8xf32>
    %93 = vector.shape_cast %92 : vector<8x8xf32> to vector<1x8x8xf32>
    %94 = vector.extract_strided_slice %55 {offsets = [8, 0], sizes = [8, 8], strides = [1, 1]} : vector<16x32xf32> to vector<8x8xf32>
    %95 = vector.shape_cast %94 : vector<8x8xf32> to vector<1x8x8xf32>
    %96 = vector.extract_strided_slice %55 {offsets = [0, 8], sizes = [8, 8], strides = [1, 1]} : vector<16x32xf32> to vector<8x8xf32>
    %97 = vector.shape_cast %96 : vector<8x8xf32> to vector<1x8x8xf32>
    %98 = vector.extract_strided_slice %55 {offsets = [8, 8], sizes = [8, 8], strides = [1, 1]} : vector<16x32xf32> to vector<8x8xf32>
    %99 = vector.shape_cast %98 : vector<8x8xf32> to vector<1x8x8xf32>
    %100 = vector.extract_strided_slice %55 {offsets = [0, 16], sizes = [8, 8], strides = [1, 1]} : vector<16x32xf32> to vector<8x8xf32>
    %101 = vector.shape_cast %100 : vector<8x8xf32> to vector<1x8x8xf32>
    %102 = vector.extract_strided_slice %55 {offsets = [8, 16], sizes = [8, 8], strides = [1, 1]} : vector<16x32xf32> to vector<8x8xf32>
    %103 = vector.shape_cast %102 : vector<8x8xf32> to vector<1x8x8xf32>
    %104 = vector.extract_strided_slice %55 {offsets = [0, 24], sizes = [8, 8], strides = [1, 1]} : vector<16x32xf32> to vector<8x8xf32>
    %105 = vector.shape_cast %104 : vector<8x8xf32> to vector<1x8x8xf32>
    %106 = vector.extract_strided_slice %55 {offsets = [8, 24], sizes = [8, 8], strides = [1, 1]} : vector<16x32xf32> to vector<8x8xf32>
    %107 = vector.shape_cast %106 : vector<8x8xf32> to vector<1x8x8xf32>
    %108 = tpu.concatenate %93, %95, %97, %99, %101, %103, %105, %107 in 0 : vector<1x8x8xf32>, vector<1x8x8xf32>, vector<1x8x8xf32>, vector<1x8x8xf32>, vector<1x8x8xf32>, vector<1x8x8xf32>, vector<1x8x8xf32>, vector<1x8x8xf32> -> vector<8x8x8xf32>
    %109 = arith.truncf %108 : vector<8x8x8xf32> to vector<8x8x8xbf16>
    "tpu.trace_start"() <{level = 10 : i32, message = "gid,gjd->gij"}> : () -> ()
    %cst_34 = arith.constant dense<0.000000e+00> : vector<8x8x8xf32>
    %110 = tpu.matmul %73, %91, %cst_34 {dimension_numbers = #tpu.dot_dimension_numbers<[2], [2], [1], [1], [0, 0, 0, 1, 1, 1], [0], [0]>} : vector<8x8x8xbf16>, vector<8x8x8xbf16>, vector<8x8x8xf32> -> vector<8x8x8xf32>
    "tpu.trace_stop"() : () -> ()
    %cst_35 = arith.constant dense<0xFF800000> : vector<8x8xf32>
    %111 = vector.multi_reduction <maximumf>, %110, %cst_35 [1] : vector<8x8x8xf32> to vector<8x8xf32>
    %112 = vector.shape_cast %111 : vector<8x8xf32> to vector<8x1x8xf32>
    %113 = vector.broadcast %112 : vector<8x1x8xf32> to vector<8x8x8xf32>
    %114 = arith.subf %110, %113 : vector<8x8x8xf32>
    %115 = math.exp %114 : vector<8x8x8xf32>
    %cst_36 = arith.constant dense<0.000000e+00> : vector<8x8xf32>
    %116 = vector.multi_reduction <add>, %115, %cst_36 [1] : vector<8x8x8xf32> to vector<8x8xf32>
    %117 = vector.shape_cast %116 : vector<8x8xf32> to vector<8x1x8xf32>
    %118 = tpu.reciprocal %117 {approx = true} : vector<8x1x8xf32> -> vector<8x1x8xf32>
    %119 = vector.broadcast %118 : vector<8x1x8xf32> to vector<8x8x8xf32>
    %120 = arith.mulf %115, %119 : vector<8x8x8xf32>
    %121 = arith.truncf %120 : vector<8x8x8xf32> to vector<8x8x8xbf16>
    "tpu.trace_start"() <{level = 10 : i32, message = "gij,gjd->gid"}> : () -> ()
    %cst_37 = arith.constant dense<0.000000e+00> : vector<8x8x8xf32>
    %122 = tpu.matmul %121, %109, %cst_37 {dimension_numbers = #tpu.dot_dimension_numbers<[2], [1], [1], [2], [0, 0, 0, 1, 1, 2], [0], [0]>} : vector<8x8x8xbf16>, vector<8x8x8xbf16>, vector<8x8x8xf32> -> vector<8x8x8xf32>
    "tpu.trace_stop"() : () -> ()
    %123 = vector.extract_strided_slice %122 {offsets = [0, 0, 0], sizes = [1, 8, 8], strides = [1, 1, 1]} : vector<8x8x8xf32> to vector<1x8x8xf32>
    %124 = vector.shape_cast %123 : vector<1x8x8xf32> to vector<8x8xf32>
    %c0_38 = arith.constant 0 : index
    %c0_39 = arith.constant 0 : index
    %125 = vector.load %arg23[%c0_38, %c0_39] : memref<16x32xf32, #tpu.memory_space<vmem>>, vector<8x8xf32>
    tpu.vector_store %arg23[%c0_38, %c0_39], %124 {strides = array<i32>} : memref<16x32xf32, #tpu.memory_space<vmem>>, vector<8x8xf32>,
    %126 = vector.extract_strided_slice %122 {offsets = [1, 0, 0], sizes = [1, 8, 8], strides = [1, 1, 1]} : vector<8x8x8xf32> to vector<1x8x8xf32>
    %127 = vector.shape_cast %126 : vector<1x8x8xf32> to vector<8x8xf32>
    %c8 = arith.constant 8 : index
    %c0_40 = arith.constant 0 : index
    %128 = vector.load %arg23[%c8, %c0_40] : memref<16x32xf32, #tpu.memory_space<vmem>>, vector<8x8xf32>
    tpu.vector_store %arg23[%c8, %c0_40], %127 {strides = array<i32>} : memref<16x32xf32, #tpu.memory_space<vmem>>, vector<8x8xf32>,
    %129 = vector.extract_strided_slice %122 {offsets = [2, 0, 0], sizes = [1, 8, 8], strides = [1, 1, 1]} : vector<8x8x8xf32> to vector<1x8x8xf32>
    %130 = vector.shape_cast %129 : vector<1x8x8xf32> to vector<8x8xf32>
    %c0_41 = arith.constant 0 : index
    %c8_42 = arith.constant 8 : index
    %131 = vector.load %arg23[%c0_41, %c8_42] : memref<16x32xf32, #tpu.memory_space<vmem>>, vector<8x8xf32>
    tpu.vector_store %arg23[%c0_41, %c8_42], %130 {strides = array<i32>} : memref<16x32xf32, #tpu.memory_space<vmem>>, vector<8x8xf32>,
    %132 = vector.extract_strided_slice %122 {offsets = [3, 0, 0], sizes = [1, 8, 8], strides = [1, 1, 1]} : vector<8x8x8xf32> to vector<1x8x8xf32>
    %133 = vector.shape_cast %132 : vector<1x8x8xf32> to vector<8x8xf32>
    %c8_43 = arith.constant 8 : index
    %c8_44 = arith.constant 8 : index
    %134 = vector.load %arg23[%c8_43, %c8_44] : memref<16x32xf32, #tpu.memory_space<vmem>>, vector<8x8xf32>
    tpu.vector_store %arg23[%c8_43, %c8_44], %133 {strides = array<i32>} : memref<16x32xf32, #tpu.memory_space<vmem>>, vector<8x8xf32>,
    %135 = vector.extract_strided_slice %122 {offsets = [4, 0, 0], sizes = [1, 8, 8], strides = [1, 1, 1]} : vector<8x8x8xf32> to vector<1x8x8xf32>
    %136 = vector.shape_cast %135 : vector<1x8x8xf32> to vector<8x8xf32>
    %c0_45 = arith.constant 0 : index
    %c16 = arith.constant 16 : index
    %137 = vector.load %arg23[%c0_45, %c16] : memref<16x32xf32, #tpu.memory_space<vmem>>, vector<8x8xf32>
    tpu.vector_store %arg23[%c0_45, %c16], %136 {strides = array<i32>} : memref<16x32xf32, #tpu.memory_space<vmem>>, vector<8x8xf32>,
    %138 = vector.extract_strided_slice %122 {offsets = [5, 0, 0], sizes = [1, 8, 8], strides = [1, 1, 1]} : vector<8x8x8xf32> to vector<1x8x8xf32>
    %139 = vector.shape_cast %138 : vector<1x8x8xf32> to vector<8x8xf32>
    %c8_46 = arith.constant 8 : index
    %c16_47 = arith.constant 16 : index
    %140 = vector.load %arg23[%c8_46, %c16_47] : memref<16x32xf32, #tpu.memory_space<vmem>>, vector<8x8xf32>
    tpu.vector_store %arg23[%c8_46, %c16_47], %139 {strides = array<i32>} : memref<16x32xf32, #tpu.memory_space<vmem>>, vector<8x8xf32>,
    %141 = vector.extract_strided_slice %122 {offsets = [6, 0, 0], sizes = [1, 8, 8], strides = [1, 1, 1]} : vector<8x8x8xf32> to vector<1x8x8xf32>
    %142 = vector.shape_cast %141 : vector<1x8x8xf32> to vector<8x8xf32>
    %c0_48 = arith.constant 0 : index
    %c24 = arith.constant 24 : index
    %143 = vector.load %arg23[%c0_48, %c24] : memref<16x32xf32, #tpu.memory_space<vmem>>, vector<8x8xf32>
    tpu.vector_store %arg23[%c0_48, %c24], %142 {strides = array<i32>} : memref<16x32xf32, #tpu.memory_space<vmem>>, vector<8x8xf32>,
    %144 = vector.extract_strided_slice %122 {offsets = [7, 0, 0], sizes = [1, 8, 8], strides = [1, 1, 1]} : vector<8x8x8xf32> to vector<1x8x8xf32>
    %145 = vector.shape_cast %144 : vector<1x8x8xf32> to vector<8x8xf32>
    %c8_49 = arith.constant 8 : index
    %c24_50 = arith.constant 24 : index
    %146 = vector.load %arg23[%c8_49, %c24_50] : memref<16x32xf32, #tpu.memory_space<vmem>>, vector<8x8xf32>
    tpu.vector_store %arg23[%c8_49, %c24_50], %145 {strides = array<i32>} : memref<16x32xf32, #tpu.memory_space<vmem>>, vector<8x8xf32>,
    %c0_51 = arith.constant 0 : index
    %c0_52 = arith.constant 0 : index
    %147 = vector.load %arg23[%c0_51, %c0_52] : memref<16x32xf32, #tpu.memory_space<vmem>>, vector<16x32xf32>
    %148 = arith.truncf %147 : vector<16x32xf32> to vector<16x32xbf16>
    %c0_53 = arith.constant 0 : index
    %c0_54 = arith.constant 0 : index
    %c0_55 = arith.constant 0 : index
    %149 = vector.load %arg11[%c0_53, %c0_54, %c0_55] : memref<1x32x32xbf16, #tpu.memory_space<vmem>>, vector<1x32x32xbf16>
    %150 = vector.shape_cast %149 : vector<1x32x32xbf16> to vector<32x32xbf16>
    %cst_56 = arith.constant dense<0.000000e+00> : vector<16x32xf32>
    %151 = tpu.matmul %148, %150, %cst_56 {dimension_numbers = #tpu.dot_dimension_numbers<[1], [0], [0], [1], [0, 0, 1, 1], [], []>} : vector<16x32xbf16>, vector<32x32xbf16>, vector<16x32xf32> -> vector<16x32xf32>
    %c0_57 = arith.constant 0 : index
    %c0_58 = arith.constant 0 : index
    %c0_59 = arith.constant 0 : index
    %152 = vector.load %arg12[%c0_57, %c0_58, %c0_59] : memref<1x1x32xf32, #tpu.memory_space<vmem>>, vector<1x1x32xf32>
    %153 = vector.shape_cast %152 : vector<1x1x32xf32> to vector<1x32xf32>
    %154 = vector.broadcast %153 : vector<1x32xf32> to vector<16x32xf32>
    %155 = arith.addf %151, %154 : vector<16x32xf32>
    %156 = arith.addf %3, %155 : vector<16x32xf32>
    %cst_60 = arith.constant dense<0.000000e+00> : vector<16xf32>
    %157 = vector.multi_reduction <add>, %156, %cst_60 [1] : vector<16x32xf32> to vector<16xf32>
    %158 = vector.shape_cast %157 : vector<16xf32> to vector<16x1xf32>
    %cst_61 = arith.constant 3.200000e+01 : f32
    %159 = vector.broadcast %cst_61 : f32 to vector<16x1xf32>
    %160 = arith.divf %158, %159 : vector<16x1xf32>
    %161 = vector.broadcast %160 : vector<16x1xf32> to vector<16x32xf32>
    %162 = arith.subf %156, %161 : vector<16x32xf32>
    %163 = arith.mulf %162, %162 : vector<16x32xf32>
    %cst_62 = arith.constant dense<0.000000e+00> : vector<16xf32>
    %164 = vector.multi_reduction <add>, %163, %cst_62 [1] : vector<16x32xf32> to vector<16xf32>
    %165 = vector.shape_cast %164 : vector<16xf32> to vector<16x1xf32>
    %cst_63 = arith.constant 3.200000e+01 : f32
    %166 = vector.broadcast %cst_63 : f32 to vector<16x1xf32>
    %167 = arith.divf %165, %166 : vector<16x1xf32>
    %168 = vector.broadcast %160 : vector<16x1xf32> to vector<16x32xf32>
    %169 = arith.subf %156, %168 : vector<16x32xf32>
    %cst_64 = arith.constant 9.99999974E-6 : f32
    %170 = vector.broadcast %cst_64 : f32 to vector<16x1xf32>
    %171 = arith.addf %167, %170 : vector<16x1xf32>
    %172 = math.rsqrt %171 : vector<16x1xf32>
    %173 = vector.broadcast %172 : vector<16x1xf32> to vector<16x32xf32>
    %174 = arith.mulf %169, %173 : vector<16x32xf32>
    %175 = vector.broadcast %5 : vector<1x32xf32> to vector<16x32xf32>
    %176 = arith.mulf %174, %175 : vector<16x32xf32>
    %177 = vector.broadcast %7 : vector<1x32xf32> to vector<16x32xf32>
    %178 = arith.addf %176, %177 : vector<16x32xf32>
    %179 = arith.truncf %178 : vector<16x32xf32> to vector<16x32xbf16>
    %c0_65 = arith.constant 0 : index
    %c0_66 = arith.constant 0 : index
    %c0_67 = arith.constant 0 : index
    %180 = vector.load %arg13[%c0_65, %c0_66, %c0_67] : memref<1x32x64xbf16, #tpu.memory_space<vmem>>, vector<1x32x64xbf16>
    %181 = vector.shape_cast %180 : vector<1x32x64xbf16> to vector<32x64xbf16>
    %cst_68 = arith.constant dense<0.000000e+00> : vector<16x64xf32>
    %182 = tpu.matmul %179, %181, %cst_68 {dimension_numbers = #tpu.dot_dimension_numbers<[1], [0], [0], [1], [0, 0, 1, 1], [], []>} : vector<16x32xbf16>, vector<32x64xbf16>, vector<16x64xf32> -> vector<16x64xf32>
    %c0_69 = arith.constant 0 : index
    %c0_70 = arith.constant 0 : index
    %c0_71 = arith.constant 0 : index
    %183 = vector.load %arg14[%c0_69, %c0_70, %c0_71] : memref<1x1x64xf32, #tpu.memory_space<vmem>>, vector<1x1x64xf32>
    %184 = vector.shape_cast %183 : vector<1x1x64xf32> to vector<1x64xf32>
    %185 = vector.broadcast %184 : vector<1x64xf32> to vector<16x64xf32>
    %186 = arith.addf %182, %185 : vector<16x64xf32>
    %cst_72 = arith.constant 0.000000e+00 : f32
    %187 = vector.broadcast %cst_72 : f32 to vector<16x64xf32>
    %188 = arith.maximumf %186, %187 : vector<16x64xf32>
    %189 = arith.truncf %188 : vector<16x64xf32> to vector<16x64xbf16>
    %c0_73 = arith.constant 0 : index
    %c0_74 = arith.constant 0 : index
    %c0_75 = arith.constant 0 : index
    %190 = vector.load %arg15[%c0_73, %c0_74, %c0_75] : memref<1x64x32xbf16, #tpu.memory_space<vmem>>, vector<1x64x32xbf16>
    %191 = vector.shape_cast %190 : vector<1x64x32xbf16> to vector<64x32xbf16>
    %cst_76 = arith.constant dense<0.000000e+00> : vector<16x32xf32>
    %192 = tpu.matmul %189, %191, %cst_76 {dimension_numbers = #tpu.dot_dimension_numbers<[1], [0], [0], [1], [0, 0, 1, 1], [], []>} : vector<16x64xbf16>, vector<64x32xbf16>, vector<16x32xf32> -> vector<16x32xf32>
    %c0_77 = arith.constant 0 : index
    %c0_78 = arith.constant 0 : index
    %c0_79 = arith.constant 0 : index
    %193 = vector.load %arg16[%c0_77, %c0_78, %c0_79] : memref<1x1x32xf32, #tpu.memory_space<vmem>>, vector<1x1x32xf32>
    %194 = vector.shape_cast %193 : vector<1x1x32xf32> to vector<1x32xf32>
    %195 = vector.broadcast %194 : vector<1x32xf32> to vector<16x32xf32>
    %196 = arith.addf %192, %195 : vector<16x32xf32>
    %197 = arith.addf %178, %196 : vector<16x32xf32>
    %cst_80 = arith.constant dense<0.000000e+00> : vector<16xf32>
    %198 = vector.multi_reduction <add>, %197, %cst_80 [1] : vector<16x32xf32> to vector<16xf32>
    %199 = vector.shape_cast %198 : vector<16xf32> to vector<16x1xf32>
    %cst_81 = arith.constant 3.200000e+01 : f32
    %200 = vector.broadcast %cst_81 : f32 to vector<16x1xf32>
    %201 = arith.divf %199, %200 : vector<16x1xf32>
    %202 = vector.broadcast %201 : vector<16x1xf32> to vector<16x32xf32>
    %203 = arith.subf %197, %202 : vector<16x32xf32>
    %204 = arith.mulf %203, %203 : vector<16x32xf32>
    %cst_82 = arith.constant dense<0.000000e+00> : vector<16xf32>
    %205 = vector.multi_reduction <add>, %204, %cst_82 [1] : vector<16x32xf32> to vector<16xf32>
    %206 = vector.shape_cast %205 : vector<16xf32> to vector<16x1xf32>
    %cst_83 = arith.constant 3.200000e+01 : f32
    %207 = vector.broadcast %cst_83 : f32 to vector<16x1xf32>
    %208 = arith.divf %206, %207 : vector<16x1xf32>
    %209 = vector.broadcast %201 : vector<16x1xf32> to vector<16x32xf32>
    %210 = arith.subf %197, %209 : vector<16x32xf32>
    %cst_84 = arith.constant 9.99999974E-6 : f32
    %211 = vector.broadcast %cst_84 : f32 to vector<16x1xf32>
    %212 = arith.addf %208, %211 : vector<16x1xf32>
    %213 = math.rsqrt %212 : vector<16x1xf32>
    %214 = vector.broadcast %213 : vector<16x1xf32> to vector<16x32xf32>
    %215 = arith.mulf %210, %214 : vector<16x32xf32>
    %216 = vector.broadcast %5 : vector<1x32xf32> to vector<16x32xf32>
    %217 = arith.mulf %215, %216 : vector<16x32xf32>
    %218 = vector.broadcast %7 : vector<1x32xf32> to vector<16x32xf32>
    %219 = arith.addf %217, %218 : vector<16x32xf32>
    %c0_85 = arith.constant 0 : index
    %c0_86 = arith.constant 0 : index
    %220 = vector.load %arg22[%c0_85, %c0_86] : memref<16x32xf32, #tpu.memory_space<vmem>>, vector<16x32xf32>
    tpu.vector_store %arg22[%c0_85, %c0_86], %219 {strides = array<i32>} : memref<16x32xf32, #tpu.memory_space<vmem>>, vector<16x32xf32>,
    %c1_i32 = arith.constant 1 : i32
    %221 = arith.cmpi eq, %arg1, %c1_i32 : i32
    %222 = arith.extui %221 : i1 to i32
    %c0_i32_87 = arith.constant 0 : i32
    %223 = arith.cmpi ne, %222, %c0_i32_87 : i32
    scf.if %223 {
      %c0_88 = arith.constant 0 : index
      %c0_89 = arith.constant 0 : index
      %224 = vector.load %arg17[%c0_88, %c0_89] : memref<1x32xf32, #tpu.memory_space<vmem>>, vector<1x32xf32>
      %c0_90 = arith.constant 0 : index
      %c0_91 = arith.constant 0 : index
      %225 = vector.load %arg18[%c0_90, %c0_91] : memref<1x32xf32, #tpu.memory_space<vmem>>, vector<1x32xf32>
      %cst_92 = arith.constant dense<0.000000e+00> : vector<16xf32>
      %226 = vector.multi_reduction <add>, %219, %cst_92 [1] : vector<16x32xf32> to vector<16xf32>
      %227 = vector.shape_cast %226 : vector<16xf32> to vector<16x1xf32>
      %cst_93 = arith.constant 3.200000e+01 : f32
      %228 = vector.broadcast %cst_93 : f32 to vector<16x1xf32>
      %229 = arith.divf %227, %228 : vector<16x1xf32>
      %230 = vector.broadcast %229 : vector<16x1xf32> to vector<16x32xf32>
      %231 = arith.subf %219, %230 : vector<16x32xf32>
      %232 = arith.mulf %231, %231 : vector<16x32xf32>
      %cst_94 = arith.constant dense<0.000000e+00> : vector<16xf32>
      %233 = vector.multi_reduction <add>, %232, %cst_94 [1] : vector<16x32xf32> to vector<16xf32>
      %234 = vector.shape_cast %233 : vector<16xf32> to vector<16x1xf32>
      %cst_95 = arith.constant 3.200000e+01 : f32
      %235 = vector.broadcast %cst_95 : f32 to vector<16x1xf32>
      %236 = arith.divf %234, %235 : vector<16x1xf32>
      %237 = vector.broadcast %229 : vector<16x1xf32> to vector<16x32xf32>
      %238 = arith.subf %219, %237 : vector<16x32xf32>
      %cst_96 = arith.constant 9.99999974E-6 : f32
      %239 = vector.broadcast %cst_96 : f32 to vector<16x1xf32>
      %240 = arith.addf %236, %239 : vector<16x1xf32>
      %241 = math.rsqrt %240 : vector<16x1xf32>
      %242 = vector.broadcast %241 : vector<16x1xf32> to vector<16x32xf32>
      %243 = arith.mulf %238, %242 : vector<16x32xf32>
      %244 = vector.broadcast %224 : vector<1x32xf32> to vector<16x32xf32>
      %245 = arith.mulf %243, %244 : vector<16x32xf32>
      %246 = vector.broadcast %225 : vector<1x32xf32> to vector<16x32xf32>
      %247 = arith.addf %245, %246 : vector<16x32xf32>
      %c0_97 = arith.constant 0 : index
      %c0_98 = arith.constant 0 : index
      %248 = vector.load %arg19[%c0_97, %c0_98] : memref<32x4xf32, #tpu.memory_space<vmem>>, vector<32x4xf32>
      %cst_99 = arith.constant dense<0.000000e+00> : vector<16x4xf32>
      %249 = tpu.matmul %247, %248, %cst_99 {dimension_numbers = #tpu.dot_dimension_numbers<[1], [0], [0], [1], [0, 0, 1, 1], [], []>} : vector<16x32xf32>, vector<32x4xf32>, vector<16x4xf32> -> vector<16x4xf32>
      %c0_100 = arith.constant 0 : index
      %c0_101 = arith.constant 0 : index
      %250 = vector.load %arg20[%c0_100, %c0_101] : memref<1x4xf32, #tpu.memory_space<vmem>>, vector<1x4xf32>
      %251 = vector.broadcast %250 : vector<1x4xf32> to vector<16x4xf32>
      %252 = arith.addf %249, %251 : vector<16x4xf32>
      %c0_102 = arith.constant 0 : index
      %c0_103 = arith.constant 0 : index
      %253 = vector.load %arg21[%c0_102, %c0_103] : memref<16x4xf32, #tpu.memory_space<vmem>>, vector<16x4xf32>
      tpu.vector_store %arg21[%c0_102, %c0_103], %252 {strides = array<i32>} : memref<16x4xf32, #tpu.memory_space<vmem>>, vector<16x4xf32>,
    } else {
    }
    return
  }
  func.func @transform_0(%arg0: i32, %arg1: i32) -> (i32, i32) {
    %c0_i32 = arith.constant 0 : i32
    %c0_i32_0 = arith.constant 0 : i32
    return %arg0, %c0_i32 : i32, i32
  }
  func.func @transform_1(%arg0: i32, %arg1: i32) -> (i32, i32, i32) {
    %c0_i32 = arith.constant 0 : i32
    %c0_i32_0 = arith.constant 0 : i32
    %c0_i32_1 = arith.constant 0 : i32
    return %arg1, %c0_i32, %c0_i32_0 : i32, i32, i32
  }
  func.func @transform_2(%arg0: i32, %arg1: i32) -> (i32, i32, i32) {
    %c0_i32 = arith.constant 0 : i32
    %c0_i32_0 = arith.constant 0 : i32
    %c0_i32_1 = arith.constant 0 : i32
    return %arg1, %c0_i32, %c0_i32_0 : i32, i32, i32
  }
  func.func @transform_3(%arg0: i32, %arg1: i32) -> (i32, i32, i32) {
    %c0_i32 = arith.constant 0 : i32
    %c0_i32_0 = arith.constant 0 : i32
    %c0_i32_1 = arith.constant 0 : i32
    return %arg1, %c0_i32, %c0_i32_0 : i32, i32, i32
  }
  func.func @transform_4(%arg0: i32, %arg1: i32) -> (i32, i32, i32) {
    %c0_i32 = arith.constant 0 : i32
    %c0_i32_0 = arith.constant 0 : i32
    %c0_i32_1 = arith.constant 0 : i32
    return %arg1, %c0_i32, %c0_i32_0 : i32, i32, i32
  }
  func.func @transform_5(%arg0: i32, %arg1: i32) -> (i32, i32, i32) {
    %c0_i32 = arith.constant 0 : i32
    %c0_i32_0 = arith.constant 0 : i32
    %c0_i32_1 = arith.constant 0 : i32
    return %arg1, %c0_i32, %c0_i32_0 : i32, i32, i32
  }
  func.func @transform_6(%arg0: i32, %arg1: i32) -> (i32, i32, i32) {
    %c0_i32 = arith.constant 0 : i32
    %c0_i32_0 = arith.constant 0 : i32
    %c0_i32_1 = arith.constant 0 : i32
    return %arg1, %c0_i32, %c0_i32_0 : i32, i32, i32
  }
  func.func @transform_7(%arg0: i32, %arg1: i32) -> (i32, i32, i32) {
    %c0_i32 = arith.constant 0 : i32
    %c0_i32_0 = arith.constant 0 : i32
    %c0_i32_1 = arith.constant 0 : i32
    return %arg1, %c0_i32, %c0_i32_0 : i32, i32, i32
  }
  func.func @transform_8(%arg0: i32, %arg1: i32) -> (i32, i32, i32) {
    %c0_i32 = arith.constant 0 : i32
    %c0_i32_0 = arith.constant 0 : i32
    %c0_i32_1 = arith.constant 0 : i32
    return %arg1, %c0_i32, %c0_i32_0 : i32, i32, i32
  }
  func.func @transform_9(%arg0: i32, %arg1: i32) -> (i32, i32, i32) {
    %c0_i32 = arith.constant 0 : i32
    %c0_i32_0 = arith.constant 0 : i32
    %c0_i32_1 = arith.constant 0 : i32
    return %arg1, %c0_i32, %c0_i32_0 : i32, i32, i32
  }
  func.func @transform_10(%arg0: i32, %arg1: i32) -> (i32, i32, i32) {
    %c0_i32 = arith.constant 0 : i32
    %c0_i32_0 = arith.constant 0 : i32
    %c0_i32_1 = arith.constant 0 : i32
    return %arg1, %c0_i32, %c0_i32_0 : i32, i32, i32
  }
  func.func @transform_11(%arg0: i32, %arg1: i32) -> (i32, i32, i32) {
    %c0_i32 = arith.constant 0 : i32
    %c0_i32_0 = arith.constant 0 : i32
    %c0_i32_1 = arith.constant 0 : i32
    return %arg1, %c0_i32, %c0_i32_0 : i32, i32, i32
  }
  func.func @transform_12(%arg0: i32, %arg1: i32) -> (i32, i32, i32) {
    %c0_i32 = arith.constant 0 : i32
    %c0_i32_0 = arith.constant 0 : i32
    %c0_i32_1 = arith.constant 0 : i32
    return %arg1, %c0_i32, %c0_i32_0 : i32, i32, i32
  }
  func.func @transform_13(%arg0: i32, %arg1: i32) -> (i32, i32, i32) {
    %c0_i32 = arith.constant 0 : i32
    %c0_i32_0 = arith.constant 0 : i32
    %c0_i32_1 = arith.constant 0 : i32
    return %arg1, %c0_i32, %c0_i32_0 : i32, i32, i32
  }
  func.func @transform_14(%arg0: i32, %arg1: i32) -> (i32, i32, i32) {
    %c0_i32 = arith.constant 0 : i32
    %c0_i32_0 = arith.constant 0 : i32
    %c0_i32_1 = arith.constant 0 : i32
    return %arg1, %c0_i32, %c0_i32_0 : i32, i32, i32
  }
  func.func @transform_15(%arg0: i32, %arg1: i32) -> (i32, i32) {
    %c0_i32 = arith.constant 0 : i32
    %c0_i32_0 = arith.constant 0 : i32
    %c0_i32_1 = arith.constant 0 : i32
    return %c0_i32, %c0_i32_0 : i32, i32
  }
  func.func @transform_16(%arg0: i32, %arg1: i32) -> (i32, i32) {
    %c0_i32 = arith.constant 0 : i32
    %c0_i32_0 = arith.constant 0 : i32
    %c0_i32_1 = arith.constant 0 : i32
    return %c0_i32, %c0_i32_0 : i32, i32
  }
  func.func @transform_17(%arg0: i32, %arg1: i32) -> (i32, i32) {
    %c0_i32 = arith.constant 0 : i32
    %c0_i32_0 = arith.constant 0 : i32
    %c0_i32_1 = arith.constant 0 : i32
    return %c0_i32, %c0_i32_0 : i32, i32
  }
  func.func @transform_18(%arg0: i32, %arg1: i32) -> (i32, i32) {
    %c0_i32 = arith.constant 0 : i32
    %c0_i32_0 = arith.constant 0 : i32
    %c0_i32_1 = arith.constant 0 : i32
    return %c0_i32, %c0_i32_0 : i32, i32
  }
  func.func @transform_19(%arg0: i32, %arg1: i32) -> (i32, i32) {
    %c0_i32 = arith.constant 0 : i32
    %c0_i32_0 = arith.constant 0 : i32
    return %arg0, %c0_i32 : i32, i32
  }
}

</mosaic_0001>

<bundles_post_ra>
// kernel: transformer_forward.1
= control target key start
LH: loop header
LB: loop body
LE: loop exit
PB: predicated region body
PF: predicated region fallthrough
CT: control target
= control target key end

     0   :  { %s3338_s30 = smov 0   ;;  %s3340_s20 = smov 0   ;;  %s3711_s0 = inlined_call_operand.vmem [shape: f32[16,32], index: 0, kind: input, shape index: {}]   ;;  %s3712_s1 = inlined_call_operand.vmem [shape: f32[2,1,32], index: 1, kind: input, shape index: {}]   ;;  %s3713_s2 = inlined_call_operand.vmem [shape: f32[2,1,32], index: 2, kind: input, shape index: {}]   ;;  %s3714_s3 = inlined_call_operand.vmem [shape: bf16[2,32,32], index: 3, kind: input, shape index: {}]   ;;  %s3715_s4 = inlined_call_operand.vmem [shape: f32[2,1,32], index: 4, kind: input, shape index: {}]   ;;  %s3716_s5 = inlined_call_operand.vmem [shape: bf16[2,32,32], index: 5, kind: input, shape index: {}]   ;;  %s3717_s6 = inlined_call_operand.vmem [shape: f32[2,1,32], index: 6, kind: input, shape index: {}]   ;;  %s3718_s7 = inlined_call_operand.vmem [shape: bf16[2,32,32], index: 7, kind: input, shape index: {}]   ;;  %s3719_s8 = inlined_call_operand.vmem [shape: f32[2,1,32], index: 8, kind: input, shape index: {}]   ;;  %s3720_s9 = inlined_call_operand.vmem [shape: bf16[2,32,32], index: 9, kind: input, shape index: {}]   ;;  %s3721_s10 = inlined_call_operand.vmem [shape: f32[2,1,32], index: 10, kind: input, shape index: {}]   ;;  %s3722_s11 = inlined_call_operand.vmem [shape: bf16[2,32,64], index: 11, kind: input, shape index: {}]   ;;  %s3723_s12 = inlined_call_operand.vmem [shape: f32[2,1,64], index: 12, kind: input, shape index: {}]   ;;  %s3724_s13 = inlined_call_operand.vmem [shape: bf16[2,64,32], index: 13, kind: input, shape index: {}]   ;;  %s3725_s14 = inlined_call_operand.vmem [shape: f32[2,1,32], index: 14, kind: input, shape index: {}]   ;;  %s3726_s15 = inlined_call_operand.vmem [shape: f32[1,32], index: 15, kind: input, shape index: {}]   ;;  %s3727_s16 = inlined_call_operand.vmem [shape: f32[1,32], index: 16, kind: input, shape index: {}]   ;;  %s3728_s17 = inlined_call_operand.vmem [shape: f32[32,4], index: 17, kind: input, shape index: {}]   ;;  %s3729_s18 = inlined_call_operand.vmem [shape: f32[1,4], index: 18, kind: input, shape index: {}]   ;;  %s3730_s19 = inlined_call_operand.vmem [shape: f32[16,4], index: 19, kind: output, shape index: {}]  }
   0x1   :  { %3737 = sst [smem:[#allocation8_spill]] %s3711_s0  ;;  %s3336_s0 = smov 0  }
   0x2   :  { %3738 = sst [smem:[#allocation9_spill]] %s3712_s1 }
   0x3   :  { %3739 = sst [smem:[#allocation10_spill]] %s3713_s2 }
   0x4   :  { %3740 = sst [smem:[#allocation11_spill]] %s3714_s3 }
   0x5   :  { %3741 = sst [smem:[#allocation12_spill]] %s3716_s5 }
   0x6   :  { %3742 = sst [smem:[#allocation13_spill]] %s3718_s7 }
   0x7   :  { %3743 = sst [smem:[#allocation14_spill]] %s3720_s9 }
   0x8   :  { %3744 = sst [smem:[#allocation15_spill]] %s3726_s15 }
   0x9   :  { %3745 = sst [smem:[#allocation16_spill]] %s3727_s16 }
   0xa   :  { %3746 = sst [smem:[#allocation17_spill]] %s3728_s17 }
   0xb   :  { %3747 = sst [smem:[#allocation18_spill]] %s3729_s18 }
   0xc   :  { %3748 = sst [smem:[#allocation19_spill]] %s3730_s19 }
   0xd LB: > { %3749 = sst [smem:[#allocation4_spill]] %s3222_s30  ;;  %s38_s21 = sadd.s32 1, %s3222_s30  ;;  %s3226_s20 = sphi %s3340_s20, %s29_s20   ;;  %s3222_s30 = sphi %s3338_s30, %s3771_s30   ;;  %s3218_s0 = sphi %s3336_s0, %s3770_s0  }
   0xe   : > { %3750 = sst [smem:[#allocation5_spill]] %s3226_s20  ;;  %p2770_p0 = scmp.ge.s32.totalorder %s3226_s20, 1 }
   0xf   : > { %p39_p1 = scmp.ge.s32.totalorder %s38_s21, 2  ;;  %p674_p2 = scmp.lt.s32.totalorder %s3226_s20, 3 }
  0x11   : > { %s3773_s21 = smov (%p39_p1, %s38_s21), 0  ;;  %p675_p3 = pnand %p2770_p0, %p674_p2 }
  0x12   : > { %3751 = sst [smem:[#allocation6_spill]] %s3773_s21 }
  0x13   : > { %678 = sbr.rel (%p675_p3) target bundleno = 3018 (0xbca), region = 96 }
  0x18   : > { %p790_p4 = scmp.lt.s32.totalorder %s3218_s0, 1  ;;  %s3752_s23 = sld [smem:[#allocation9_spill]] }
  0x19   : > { %s3753_s26 = sld [smem:[#allocation10_spill]]  ;;  %p2783_p5 = scmp.ne.s32.totalorder %s3218_s0, 0 }
  0x1a   : > { %s3358_s1 = scalar_select %p790_p4, %s3218_s0, 1 }
  0x1b   : > { %s3755_s20 = sld [smem:[#allocation11_spill]] }
  0x1c   : > { %s2838_s28 = sshll.u32 %s3358_s1, 4  ;;  %s3756_s5 = sld [smem:[#allocation12_spill]] }
  0x1d   : > { %s3757_s7 = sld [smem:[#allocation13_spill]]  ;;  %s3412_s25 = scalar_lea.vmem %s3722_s11, %s2838_s28 }
  0x1e   : > { %s3364_s24 = scalar_lea.vmem %s3752_s23, %s3358_s1  ;;  %s3758_s9 = sld [smem:[#allocation14_spill]] }
  0x1f   : > { %s3370_s27 = scalar_lea.vmem %s3753_s26, %s3358_s1  ;;  %s2843_s21 = sshll.u32 %s3358_s1, 5 }
  0x20   : > { %3754 = sst [smem:[#allocation7_spill]] %s3370_s27  ;;  %s843_s16 = scalar_lea.vmem %s3725_s14, %s3358_s1 }
  0x21   : > { %s3380_s19 = scalar_lea.vmem %s3755_s20, %s2838_s28  ;;  %s3422_s20 = scalar_lea.vmem %s3724_s13, %s2843_s21 }
  0x22   : > { %s3385_s23 = scalar_lea.vmem %s3756_s5, %s2838_s28  ;;  %s827_s5 = scalar_lea.vmem %s3721_s10, %s3358_s1 }
  0x23   : > { %s3394_s27 = scalar_lea.vmem %s3757_s7, %s2838_s28  ;;  %s835_s7 = scalar_lea.vmem %s3723_s12, %s3358_s1 }
  0x24   : > { %s3403_s22 = scalar_lea.vmem %s3758_s9, %s2838_s28  ;;  %854 = sbr.rel (%p2783_p5) target bundleno = 45 (0x2d), region = 100 }
  0x25   : > { %s3759_s15 = sld [smem:[#allocation8_spill]] (!%p2783_p5) }
  0x29   : > { %vm857_vm0 = vcmask 261120  }
  0x2b   : > { %v855_v0 = vld [vmem:[%s3759_s15] sm:$0xff]  ;;  %v856_v1 = vld [vmem:[%s3759_s15 + $0x8] sm:$0xff] }
  0x2c   : > { %858 = vst.msk [vmem:[#allocation2] sm:$0xff] %vm857_vm0, %v855_v0  ;;  %859 = vst.msk [vmem:[#allocation2 + $0x8] sm:$0xff] %vm857_vm0, %v856_v1 }
  0x2d PF: > { %vm864_vm1 = vcmask 261120   ;;  %v3138_v16 = vld [vmem:[%s3380_s19 + $0x8] sm:$0xff]   ;;  %v3228_v18 = vmov 0.0   ;;  %v3140_v19 = vld [vmem:[%s3380_s19] sm:$0xff]   ;;  %vm3229_vm2 = vmmov 0   ;;  %s3760_s9 = sld [smem:[#allocation7_spill]]  ;;  %s3762_s21 = scalar_lea.vmem %s3715_s4, %s3358_s1 }
  0x2e   : > { %v3139_v17 = vld [vmem:[%s3385_s23 + $0x8] sm:$0xff]   ;;  %2902 = vmatprep.subr.bf16.mxu0 %v3228_v18  ;;  %2910 = vmatprep.subr.bf16.mxu1 %v3228_v18  ;;  %v3141_v20 = vld [vmem:[%s3385_s23] sm:$0xff]   ;;  %vm1190_vm3 = vcmask 64512   ;;  %s3230_s29 = smov 120   ;;  %s3763_s28 = scalar_lea.vmem %s3719_s8, %s3358_s1  ;;  %vm1722_vm4 = vcmask 1043456   ;;  %vm2094_vm5 = vcmask 130112  }
  0x2f   : > { %2903 = vmatpush3.bf16.msra.mxu0 %v3138_v16  ;;  %2911 = vmatpush3.bf16.msra.mxu1 %v3139_v17  ;;  %v2784_v29 = vld [vmem:[%s3364_s24] ss:$0 sm:$0xff]  ;;  %v3142_v37 = vld [vmem:[%s3394_s27 + $0x8] sm:$0xff]   ;;  %s3231_s17 = smov 104   ;;  %s3232_s3 = smov 112   ;;  %vm2105_vm6 = vcmask 195712  }
  0x30   : > { %2904 = vmatprep.subr.bf16.mxu0 %v3228_v18  ;;  %2912 = vmatprep.subr.bf16.mxu1 %v3228_v18  ;;  %v3143_v39 = vld [vmem:[%s3394_s27] sm:$0xff]   ;;  %s3761_s27 = scalar_lea.vmem %s3717_s6, %s3358_s1  ;;  %s3233_s19 = smov 8   ;;  %vm2116_vm7 = vcmask 261312   ;;  %vm2335_vm8 = vcmask 523264  }
  0x31   : > { %2906 = vmatprep.mubr.msk.bf16.mxu0 %vm3229_vm2, %v3228_v18  ;;  %2914 = vmatprep.mubr.msk.bf16.mxu1 %vm3229_vm2, %v3228_v18  ;;  %v2790_v40 = vld [vmem:[%s3761_s27] ss:$0 sm:$0xff]  ;;  %s3234_s23 = smov 16   ;;  %s3235_s27 = smov 24  }
  0x32   : > { %v2786_v41 = vld [vmem:[%s3762_s21] ss:$0 sm:$0xff]  ;;  %p2828_p6 = scmp.ne.s32.totalorder %s3218_s0, 1 }
  0x33   : > { %v860_v2 = vld [vmem:[#allocation2] sm:$0xff]  ;;  %v861_v3 = vld [vmem:[#allocation2 + $0x8] sm:$0xff]  ;;  %2905 = vmatpush3.bf16.msra.mxu0 %v3140_v19  ;;  %2913 = vmatpush3.bf16.msra.mxu1 %v3141_v20  ;;  %s3764_s1 = sld [smem:[#allocation17_spill]] (!%p2828_p6) }
  0x34   : > { %v865_v4 = vsel %vm864_vm1, %v860_v2, 0.0  ;;  %v868_v5 = vsel %vm864_vm1, %v861_v3, 0.0  ;;  %2918 = vmatprep.subr.bf16.mxu0 %v3228_v18  ;;  %2926 = vmatprep.subr.bf16.mxu1 %v3228_v18  ;;  %v2785_v33 = vld [vmem:[%s3760_s9] ss:$0 sm:$0xff]  ;;  %s3767_s30 = sld [smem:[#allocation18_spill]] (!%p2828_p6) }
  0x35   : > { %866 = vadd.xlane.f32.xlu0 %v865_v4  ;;  %v2794_v63 = vld [vmem:[%s3763_s28] ss:$0 sm:$0xff] }
  0x39   : > { %869 = vadd.xlane.f32.xlu0 %v868_v5 }
  0xbe   : > { %v867_v6 = vpop.xlane.xlu0 %866 }
  0xbf   : > { %v872_v7 = vmul.f32 0.03125, %v867_v6 }
  0xc1   : > { %v874_v8 = vsub.f32 %v860_v2, %v872_v7 }
  0xc2   : > { %v870_v9 = vpop.xlane.xlu0 %869 }
  0xc3   : > { %v873_v10 = vmul.f32 0.03125, %v870_v9  ;;  %v876_v11 = vmul.f32 %v874_v8, %v874_v8 }
  0xc5   : > { %v875_v12 = vsub.f32 %v861_v3, %v873_v10  ;;  %v878_v13 = vsel %vm864_vm1, %v876_v11, 0.0 }
  0xc6   : > { %879 = vadd.xlane.f32.xlu1 %v878_v13 }
  0xc7   : > { %v877_v14 = vmul.f32 %v875_v12, %v875_v12 }
  0xc9   : > { %v881_v15 = vsel %vm864_vm1, %v877_v14, 0.0 }
  0xca   : > { %882 = vadd.xlane.f32.xlu1 %v881_v15 }
 0x14f   : > { %v880_v21 = vpop.xlane.xlu1 %879 }
 0x150   : > { %v884_v22 = vmul.f32 0.03125, %v880_v21 }
 0x152   : > { %v886_v23 = vadd.f32 1e-05, %v884_v22 }
 0x153   : > { %v883_v24 = vpop.xlane.xlu1 %882 }
 0x154   : > { %3152 = vrsqrt.f32 %v886_v23  ;;  %v885_v25 = vmul.f32 0.03125, %v883_v24 }
 0x156   : > { %v887_v26 = vadd.f32 1e-05, %v885_v25 }
 0x158   : > { %3154 = vrsqrt.f32 %v887_v26 }
 0x161   : > { %v3153_v27 = vpop.eup %3152 }
 0x162   : > { %v890_v28 = vmul.f32 %v3153_v27, %v874_v8 }
 0x164   : > { %v898_v32 = vmul.f32 %v2784_v29, %v890_v28 }
 0x165   : > { %v3155_v30 = vpop.eup %3154 }
 0x166   : > { %v891_v31 = vmul.f32 %v3155_v30, %v875_v12  ;;  %v906_v35 = vadd.f32 %v2785_v33, %v898_v32 }
 0x168   : > { %v899_v34 = vmul.f32 %v2784_v29, %v891_v31 }
 0x16a   : > { %v907_v36 = vadd.f32 %v2785_v33, %v899_v34 }
 0x16c   : > { %v908_v38 = vpack.c.bf16 %v907_v36, %v906_v35 }
 0x16e   : > { %2907 = vmatmul.mubr.msk.bf16.vlgmr.msra.gmra.mxu0 %vm864_vm1, %v908_v38  ;;  %2915 = vmatmul.mubr.msk.bf16.vlgmr.msra.gmra.mxu1 %vm864_vm1, %v908_v38 }
 0x16f   : > { %2919 = vmatpush3.bf16.msra.mxu0 %v3142_v37  ;;  %2922 = vmatprep.mubr.msk.bf16.mxu0 %vm3229_vm2, %v3228_v18 }
 0x170   : > { %2920 = vmatprep.subr.bf16.mxu0 %v3228_v18  ;;  %2928 = vmatprep.mubr.msk.bf16.mxu1 %vm3229_vm2, %v3228_v18 }
 0x173   : > { %2921 = vmatpush3.bf16.msra.mxu0 %v3143_v39 }
 0x174   : > { %2932 = vmatprep.subr.bf16.mxu0 %v3228_v18 }
 0x176   : > { %2923 = vmatmul.mubr.msk.bf16.vlgmr.msra.gmra.mxu0 %vm864_vm1, %v908_v38 }
 0x177   : > { %2934 = vmatprep.mubr.msk.bf16.mxu0 %vm3229_vm2, %v3228_v18 }
 0x22e   : > { %v969_v42 = vpop.f32.mrf.mxu0  ;;  %v1035_v43 = vpop.f32.mrf.mxu1 }
 0x22f   : > { %v1036_v44 = vadd.f32 %v2790_v40, %v1035_v43  ;;  %v970_v47 = vadd.f32 %v2786_v41, %v969_v42 }
 0x230   : > { %v2908_v45 = vpop.f32.mrf.mxu0  ;;  %v2916_v46 = vpop.f32.mrf.mxu1 }
 0x231   : > { %v1154_v48 = vpack.c.bf16 %v1036_v44, %v1036_v44  ;;  %v976_v56 = vmul.f32 0.35355338, %v970_v47 }
 0x232   : > { %v972_v49 = vpop.f32.mrf.mxu0  ;;  %v1038_v50 = vpop.f32.mrf.mxu1 }
 0x233   : > { %v973_v51 = vadd.f32 %v2786_v41, %v972_v49  ;;  %v1039_v52 = vadd.f32 %v2790_v40, %v1038_v50  ;;  %v1195_v53 = vsel %vm1190_vm3, %v1154_v48, 0  ;;  %v1126_v1 = vpack.c.bf16 %v976_v56, %v976_v56 }
 0x234   : > { %v2909_v54 = vpop.f32.mrf.mxu0  ;;  %v2917_v55 = vpop.f32.mrf.mxu1  ;;  %2927 = vmatpush3.bf16.xpose.msra.mxu1 %v1195_v53 }
 0x235   : > { %v977_v57 = vmul.f32 0.35355338, %v973_v51  ;;  %v3093_v58 = vpack.i.bf16 %v1039_v52, %v1036_v44  ;;  %v1155_v59 = vpack.c.bf16 %v1039_v52, %v1039_v52  ;;  %2938 = vmatprep.subr.bf16.mxu1 %v3228_v18 }
 0x236   : > { %v1099_v60 = vpop.f32.mrf.mxu0 }
 0x237   : > { %3094 = vrot.lane.b32.xlu0 %v3093_v58, %s3230_s29  ;;  %v1241_v61 = vsel %vm1190_vm3, %v1155_v59, 0  ;;  %v3098_v62 = vpack.i.bf16 %v977_v57, %v976_v56  ;;  %v3487_v3 = vadd.f32 %v2794_v63, %v1099_v60  ;;  %v1127_v6 = vpack.c.bf16 %v977_v57, %v977_v57 }
 0x238   : > { %v2924_v0 = vpop.f32.mrf.mxu0  ;;  %2933 = vmatpush3.bf16.xpose.msra.mxu0 %v1241_v61 }
 0x239   : > { %3099 = vrot.lane.b32.xlu1 %v3098_v62, %s3230_s29  ;;  %2944 = vmatprep.subr.bf16.mxu0 %v3228_v18  ;;  %v1182_v43 = vpack.c.bf16 %v3487_v3, %v3487_v3 }
 0x23a   : > { %v1102_v2 = vpop.f32.mrf.mxu0 }
 0x23b   : > { %v3489_v4 = vadd.f32 %v2794_v63, %v1102_v2  ;;  %3114 = vrot.lane.b32.xlu0 %v3093_v58, %s3231_s17  ;;  %2929 = vmatmul.mubr.msk.bf16.vlgmr.msra.gmra.mxu1 %vm1190_vm3, %v1126_v1  ;;  %v1724_v47 = vsel %vm1722_vm4, %v1182_v43, 0 }
 0x23c   : > { %v2925_v5 = vpop.f32.mrf.mxu0  ;;  %2940 = vmatprep.mubr.msk.bf16.mxu1 %vm3229_vm2, %v3228_v18 }
 0x23d   : > { %3104 = vrot.lane.b32.xlu1 %v3093_v58, %s3232_s3  ;;  %v3123_v7 = vpack.i.bf16 %v3489_v4, %v3487_v3  ;;  %v1183_v44 = vpack.c.bf16 %v3489_v4, %v3489_v4 }
 0x23f   : > { %2935 = vmatmul.mubr.msk.bf16.vlgmr.msra.gmra.mxu0 %vm1190_vm3, %v1127_v6  ;;  %3124 = vrot.lane.b32.xlu0 %v3123_v7, %s3230_s29  ;;  %v1770_v48 = vsel %vm1722_vm4, %v1183_v44, 0 }
 0x240   : > { %2946 = vmatprep.mubr.msk.bf16.mxu0 %vm3229_vm2, %v3228_v18 }
 0x241   : > { %3109 = vrot.lane.b32.xlu1 %v3098_v62, %s3232_s3 }
 0x243   : > { %3134 = vrot.lane.b32.xlu0 %v3123_v7, %s3231_s17 }
 0x245   : > { %3119 = vrot.lane.b32.xlu1 %v3098_v62, %s3231_s17  ;;  %s3765_s17 = sld [smem:[#allocation15_spill]] (!%p2828_p6) }
 0x249   : > { %3129 = vrot.lane.b32.xlu1 %v3123_v7, %s3232_s3 }
 0x2a9   : > { %v3095_v8 = vpop.permute.xlu0 %3094 }
 0x2aa   : > { %v3097_v9 = vunpack.i.h.bf16 %v3095_v8  ;;  %v3096_v10 = vunpack.i.l.bf16 %v3095_v8 }
 0x2ab   : > { %v3100_v11 = vpop.permute.xlu1 %3099 }
 0x2ac   : > { %v1157_v12 = vpack.c.bf16 %v3097_v9, %v3097_v9  ;;  %v1156_v13 = vpack.c.bf16 %v3096_v10, %v3096_v10  ;;  %v3102_v20 = vunpack.i.h.bf16 %v3100_v11  ;;  %v3101_v21 = vunpack.i.l.bf16 %v3100_v11 }
 0x2ad   : > { %v3115_v24 = vpop.permute.xlu0 %3114 }
 0x2ae   : > { %v1287_v14 = vsel %vm1190_vm3, %v1156_v13, 0  ;;  %v1333_v16 = vsel %vm1190_vm3, %v1157_v12, 0  ;;  %v1129_v25 = vpack.c.bf16 %v3102_v20, %v3102_v20  ;;  %v1128_v26 = vpack.c.bf16 %v3101_v21, %v3101_v21 }
 0x2af   : > { %v3105_v15 = vpop.permute.xlu1 %3104  ;;  %2939 = vmatpush3.bf16.xpose.msra.mxu1 %v1287_v14  ;;  %2945 = vmatpush3.bf16.xpose.msra.mxu0 %v1333_v16  ;;  %v3117_v28 = vunpack.i.h.bf16 %v3115_v24  ;;  %v3116_v29 = vunpack.i.l.bf16 %v3115_v24 }
 0x2b0   : > { %v3107_v17 = vunpack.i.h.bf16 %v3105_v15  ;;  %v3106_v19 = vunpack.i.l.bf16 %v3105_v15  ;;  %2950 = vmatprep.subr.bf16.mxu1 %v3228_v18  ;;  %2956 = vmatprep.subr.bf16.mxu0 %v3228_v18 }
 0x2b1   : > { %v1161_v34 = vpack.c.bf16 %v3117_v28, %v3117_v28  ;;  %v1160_v35 = vpack.c.bf16 %v3116_v29, %v3116_v29  ;;  %v3125_v28 = vpop.permute.xlu0 %3124 }
 0x2b2   : > { %v1159_v22 = vpack.c.bf16 %v3107_v17, %v3107_v17  ;;  %v1158_v23 = vpack.c.bf16 %v3106_v19, %v3106_v19  ;;  %v3126_v29 = vunpack.i.l.bf16 %v3125_v28 }
 0x2b3   : > { %v3110_v27 = vpop.permute.xlu1 %3109  ;;  %v1471_v39 = vsel %vm1190_vm3, %v1160_v35, 0  ;;  %v1517_v40 = vsel %vm1190_vm3, %v1161_v34, 0 }
 0x2b4   : > { %v1379_v30 = vsel %vm1190_vm3, %v1158_v23, 0  ;;  %v1425_v31 = vsel %vm1190_vm3, %v1159_v22, 0  ;;  %v3112_v32 = vunpack.i.h.bf16 %v3110_v27  ;;  %v3111_v33 = vunpack.i.l.bf16 %v3110_v27 }
 0x2b6   : > { %2941 = vmatmul.mubr.msk.bf16.vlgmr.msra.gmra.mxu1 %vm1190_vm3, %v1128_v26  ;;  %2947 = vmatmul.mubr.msk.bf16.vlgmr.msra.gmra.mxu0 %vm1190_vm3, %v1129_v25  ;;  %v1131_v36 = vpack.c.bf16 %v3112_v32, %v3112_v32  ;;  %v1130_v37 = vpack.c.bf16 %v3111_v33, %v3111_v33  ;;  %v1184_v32 = vpack.c.bf16 %v3126_v29, %v3126_v29 }
 0x2b7   : > { %2951 = vmatpush3.bf16.xpose.msra.mxu1 %v1379_v30  ;;  %2957 = vmatpush3.bf16.xpose.msra.mxu0 %v1425_v31  ;;  %v3120_v38 = vpop.permute.xlu1 %3119  ;;  %v3127_v31 = vunpack.i.h.bf16 %v3125_v28 }
 0x2b8   : > { %2952 = vmatprep.mubr.msk.bf16.mxu1 %vm3229_vm2, %v3228_v18  ;;  %2958 = vmatprep.mubr.msk.bf16.mxu0 %vm3229_vm2, %v3228_v18  ;;  %v3122_v41 = vunpack.i.h.bf16 %v3120_v38  ;;  %v3121_v42 = vunpack.i.l.bf16 %v3120_v38 }
 0x2b9   : > { %2962 = vmatprep.subr.bf16.mxu1 %v3228_v18  ;;  %2968 = vmatprep.subr.bf16.mxu0 %v3228_v18 }
 0x2ba   : > { %v1133_v45 = vpack.c.bf16 %v3122_v41, %v3122_v41  ;;  %v1132_v46 = vpack.c.bf16 %v3121_v42, %v3121_v42 }
 0x2be   : > { %2953 = vmatmul.mubr.msk.bf16.vlgmr.msra.gmra.mxu1 %vm1190_vm3, %v1130_v37  ;;  %2959 = vmatmul.mubr.msk.bf16.vlgmr.msra.gmra.mxu0 %vm1190_vm3, %v1131_v36  ;;  %v1185_v36 = vpack.c.bf16 %v3127_v31, %v3127_v31  ;;  %v1816_v37 = vsel %vm1722_vm4, %v1184_v32, 0 }
 0x2bf   : > { %2963 = vmatpush3.bf16.xpose.msra.mxu1 %v1471_v39  ;;  %2969 = vmatpush3.bf16.xpose.msra.mxu0 %v1517_v40 }
 0x2c0   : > { %2964 = vmatprep.mubr.msk.bf16.mxu1 %vm3229_vm2, %v3228_v18  ;;  %2970 = vmatprep.mubr.msk.bf16.mxu0 %vm3229_vm2, %v3228_v18  ;;  %v1862_v40 = vsel %vm1722_vm4, %v1185_v36, 0 }
 0x2c1   : > { %2974 = vmatprep.subr.bf16.mxu1 %v3228_v18  ;;  %2980 = vmatprep.subr.bf16.mxu0 %v3228_v18 }
 0x2c6   : > { %2965 = vmatmul.mubr.msk.bf16.vlgmr.msra.gmra.mxu1 %vm1190_vm3, %v1132_v46  ;;  %2971 = vmatmul.mubr.msk.bf16.vlgmr.msra.gmra.mxu0 %vm1190_vm3, %v1133_v45 }
 0x2c7   : > { %2975 = vmatpush3.bf16.msra.mxu1 %v1724_v47  ;;  %2981 = vmatpush3.bf16.msra.mxu0 %v1770_v48 }
 0x2c8   : > { %2976 = vmatprep.mubr.msk.bf16.mxu1 %vm3229_vm2, %v3228_v18  ;;  %2986 = vmatprep.subr.bf16.mxu1 %v3228_v18 }
 0x2c9   : > { %2982 = vmatprep.mubr.msk.bf16.mxu0 %vm3229_vm2, %v3228_v18  ;;  %2992 = vmatprep.subr.bf16.mxu0 %v3228_v18 }
 0x2fb   : > { %v1231_v49 = vpop.f32.mrf.mxu1 }
 0x2fc   : > { %v1559_v50 = vsel %vm1190_vm3, %v1231_v49, -inf }
 0x2fd   : > { %v1560_v51 = vrot.slane %v1559_v50, 4  ;;  %v2930_v52 = vpop.f32.mrf.mxu1 }
 0x2ff   : > { %v1561_v53 = vmax.f32 %v1559_v50, %v1560_v51  ;;  %v1234_v54 = vpop.f32.mrf.mxu1  ;;  %v1277_v55 = vpop.f32.mrf.mxu0 }
 0x300   : > { %v1566_v56 = vsel %vm1190_vm3, %v1277_v55, -inf }
 0x301   : > { %v1562_v57 = vrot.slane %v1561_v53, 2  ;;  %v1567_v58 = vrot.slane %v1566_v56, 4  ;;  %v2931_v59 = vpop.f32.mrf.mxu1  ;;  %v2936_v60 = vpop.f32.mrf.mxu0 }
 0x303   : > { %v1563_v61 = vmax.f32 %v1561_v53, %v1562_v57  ;;  %v1568_v62 = vmax.f32 %v1566_v56, %v1567_v58  ;;  %v1280_v63 = vpop.f32.mrf.mxu0 }
 0x305   : > { %v1564_v0 = vrot.slane %v1563_v61, 1  ;;  %v1569_v1 = vrot.slane %v1568_v62, 2  ;;  %v2937_v2 = vpop.f32.mrf.mxu0 }
 0x307   : > { %v1565_v3 = vmax.f32 %v1563_v61, %v1564_v0  ;;  %v1570_v4 = vmax.f32 %v1568_v62, %v1569_v1 }
 0x309   : > { %v1615_v5 = vsub.f32 %v1231_v49, %v1565_v3  ;;  %v1571_v6 = vrot.slane %v1570_v4, 1 }
 0x30b   : > { %v1623_v7 = vmul.f32 1.442695, %v1615_v5  ;;  %v1572_v8 = vmax.f32 %v1570_v4, %v1571_v6 }
 0x30d   : > { %3156 = vpow2.f32 %v1623_v7  ;;  %v1616_v9 = vsub.f32 %v1277_v55, %v1572_v8 }
 0x30f   : > { %v1625_v10 = vmul.f32 1.442695, %v1616_v9 }
 0x311   : > { %3158 = vpow2.f32 %v1625_v10 }
 0x31a   : > { %v3157_v11 = vpop.eup %3156 }
 0x31b   : > { %v1639_v12 = vsel %vm1190_vm3, %v3157_v11, 0.0 }
 0x31c   : > { %v1640_v13 = vrot.slane %v1639_v12, 4 }
 0x31e   : > { %v3159_v14 = vpop.eup %3158  ;;  %v1641_v15 = vadd.f32 %v1640_v13, %v1639_v12 }
 0x31f   : > { %v1646_v16 = vsel %vm1190_vm3, %v3159_v14, 0.0 }
 0x320   : > { %v1642_v17 = vrot.slane %v1641_v15, 2  ;;  %v1647_v19 = vrot.slane %v1646_v16, 4 }
 0x322   : > { %v1643_v20 = vadd.f32 %v1642_v17, %v1641_v15  ;;  %v1648_v21 = vadd.f32 %v1647_v19, %v1646_v16 }
 0x324   : > { %v1644_v22 = vrot.slane %v1643_v20, 1  ;;  %v1649_v23 = vrot.slane %v1648_v21, 2 }
 0x326   : > { %v1645_v24 = vadd.f32 %v1644_v22, %v1643_v20  ;;  %v1650_v25 = vadd.f32 %v1649_v23, %v1648_v21 }
 0x328   : > { %3160 = vrcp.f32 %v1645_v24  ;;  %v1651_v26 = vrot.slane %v1650_v25, 1 }
 0x32a   : > { %v1652_v27 = vadd.f32 %v1651_v26, %v1650_v25 }
 0x32c   : > { %3162 = vrcp.f32 %v1652_v27 }
 0x335   : > { %v3161_v30 = vpop.eup %3160 }
 0x336   : > { %v1703_v33 = vmul.f32 %v3161_v30, %v3157_v11 }
 0x338   : > { %v1711_v34 = vpack.c.bf16 %v1703_v33, %v1703_v33 }
 0x339   : > { %v3163_v35 = vpop.eup %3162 }
 0x33a   : > { %2977 = vmatmul.mubr.msk.bf16.vlgmr.msra.gmra.mxu1 %vm1190_vm3, %v1711_v34  ;;  %v1704_v38 = vmul.f32 %v3163_v35, %v3159_v14 }
 0x33b   : > { %2987 = vmatpush3.bf16.msra.mxu1 %v1816_v37  ;;  %2988 = vmatprep.mubr.msk.bf16.mxu1 %vm3229_vm2, %v3228_v18 }
 0x33c   : > { %v1712_v39 = vpack.c.bf16 %v1704_v38, %v1704_v38  ;;  %2998 = vmatprep.subr.bf16.mxu1 %v3228_v18 }
 0x33e   : > { %2983 = vmatmul.mubr.msk.bf16.vlgmr.msra.gmra.mxu0 %vm1190_vm3, %v1712_v39 }
 0x33f   : > { %2993 = vmatpush3.bf16.msra.mxu0 %v1862_v40  ;;  %2994 = vmatprep.mubr.msk.bf16.mxu0 %vm3229_vm2, %v3228_v18 }
 0x340   : > { %3004 = vmatprep.subr.bf16.mxu0 %v3228_v18 }
 0x376   : > { %v1323_v41 = vpop.f32.mrf.mxu1  ;;  %v1369_v42 = vpop.f32.mrf.mxu0 }
 0x377   : > { %v1573_v43 = vsel %vm1190_vm3, %v1323_v41, -inf  ;;  %v1580_v44 = vsel %vm1190_vm3, %v1369_v42, -inf }
 0x378   : > { %v1574_v45 = vrot.slane %v1573_v43, 4  ;;  %v1581_v46 = vrot.slane %v1580_v44, 4  ;;  %v2942_v47 = vpop.f32.mrf.mxu1  ;;  %v2948_v48 = vpop.f32.mrf.mxu0 }
 0x37a   : > { %v1575_v49 = vmax.f32 %v1573_v43, %v1574_v45  ;;  %v1582_v50 = vmax.f32 %v1580_v44, %v1581_v46  ;;  %v1326_v51 = vpop.f32.mrf.mxu1  ;;  %v1372_v52 = vpop.f32.mrf.mxu0 }
 0x37c   : > { %v1576_v53 = vrot.slane %v1575_v49, 2  ;;  %v1583_v54 = vrot.slane %v1582_v50, 2  ;;  %v2943_v55 = vpop.f32.mrf.mxu1  ;;  %v2949_v56 = vpop.f32.mrf.mxu0 }
 0x37e   : > { %v1577_v57 = vmax.f32 %v1575_v49, %v1576_v53  ;;  %v1584_v58 = vmax.f32 %v1582_v50, %v1583_v54  ;;  %v1415_v59 = vpop.f32.mrf.mxu1  ;;  %v1461_v60 = vpop.f32.mrf.mxu0 }
 0x37f   : > { %v1587_v61 = vsel %vm1190_vm3, %v1415_v59, -inf  ;;  %v1594_v62 = vsel %vm1190_vm3, %v1461_v60, -inf }
 0x380   : > { %v1578_v63 = vrot.slane %v1577_v57, 1  ;;  %v1585_v0 = vrot.slane %v1584_v58, 1  ;;  %v1588_v1 = vrot.slane %v1587_v61, 4  ;;  %v1595_v2 = vrot.slane %v1594_v62, 4  ;;  %v2954_v3 = vpop.f32.mrf.mxu1  ;;  %v2960_v4 = vpop.f32.mrf.mxu0 }
 0x382   : > { %v1579_v5 = vmax.f32 %v1577_v57, %v1578_v63  ;;  %v1586_v6 = vmax.f32 %v1584_v58, %v1585_v0  ;;  %v1589_v7 = vmax.f32 %v1587_v61, %v1588_v1  ;;  %v1596_v8 = vmax.f32 %v1594_v62, %v1595_v2  ;;  %v1418_v9 = vpop.f32.mrf.mxu1  ;;  %v1464_v10 = vpop.f32.mrf.mxu0 }
 0x384   : > { %v1617_v11 = vsub.f32 %v1323_v41, %v1579_v5  ;;  %v1618_v12 = vsub.f32 %v1369_v42, %v1586_v6  ;;  %v1590_v13 = vrot.slane %v1589_v7, 2  ;;  %v1597_v14 = vrot.slane %v1596_v8, 2  ;;  %v2955_v15 = vpop.f32.mrf.mxu1  ;;  %v2961_v16 = vpop.f32.mrf.mxu0 }
 0x386   : > { %v1627_v17 = vmul.f32 1.442695, %v1617_v11  ;;  %v1629_v19 = vmul.f32 1.442695, %v1618_v12  ;;  %v1591_v20 = vmax.f32 %v1589_v7, %v1590_v13  ;;  %v1598_v21 = vmax.f32 %v1596_v8, %v1597_v14  ;;  %v1507_v22 = vpop.f32.mrf.mxu1  ;;  %v1553_v23 = vpop.f32.mrf.mxu0 }
 0x387   : > { %v1601_v24 = vsel %vm1190_vm3, %v1507_v22, -inf  ;;  %v1608_v25 = vsel %vm1190_vm3, %v1553_v23, -inf }
 0x388   : > { %3164 = vpow2.f32 %v1627_v17  ;;  %v1592_v26 = vrot.slane %v1591_v20, 1  ;;  %v1599_v27 = vrot.slane %v1598_v21, 1  ;;  %v1602_v28 = vrot.slane %v1601_v24, 4  ;;  %v2966_v29 = vpop.f32.mrf.mxu1  ;;  %v2972_v30 = vpop.f32.mrf.mxu0 }
 0x389   : > { %3166 = vpow2.f32 %v1629_v19  ;;  %v1609_v31 = vrot.slane %v1608_v25, 4 }
 0x38a   : > { %v1593_v32 = vmax.f32 %v1591_v20, %v1592_v26  ;;  %v1600_v33 = vmax.f32 %v1598_v21, %v1599_v27  ;;  %v1603_v34 = vmax.f32 %v1601_v24, %v1602_v28  ;;  %v1510_v35 = vpop.f32.mrf.mxu1  ;;  %v1556_v36 = vpop.f32.mrf.mxu0 }
 0x38b   : > { %v1610_v37 = vmax.f32 %v1608_v25, %v1609_v31  ;;  %v3130_v31 = vpop.permute.xlu1 %3129 }
 0x38c   : > { %v1619_v38 = vsub.f32 %v1415_v59, %v1593_v32  ;;  %v1620_v39 = vsub.f32 %v1461_v60, %v1600_v33  ;;  %v1604_v40 = vrot.slane %v1603_v34, 2  ;;  %v2967_v41 = vpop.f32.mrf.mxu1  ;;  %v2973_v42 = vpop.f32.mrf.mxu0  ;;  %v3131_v36 = vunpack.i.l.bf16 %v3130_v31 }
 0x38d   : > { %v1611_v43 = vrot.slane %v1610_v37, 2 }
 0x38e   : > { %v1631_v44 = vmul.f32 1.442695, %v1619_v38  ;;  %v1633_v45 = vmul.f32 1.442695, %v1620_v39  ;;  %v1605_v46 = vmax.f32 %v1603_v34, %v1604_v40  ;;  %v3132_v38 = vunpack.i.h.bf16 %v3130_v31 }
 0x38f   : > { %v1612_v47 = vmax.f32 %v1610_v37, %v1611_v43 }
 0x390   : > { %3168 = vpow2.f32 %v1631_v44  ;;  %v1606_v48 = vrot.slane %v1605_v46, 1  ;;  %v1186_v44 = vpack.c.bf16 %v3131_v36, %v3131_v36 }
 0x391   : > { %3170 = vpow2.f32 %v1633_v45  ;;  %v1613_v49 = vrot.slane %v1612_v47, 1 }
 0x392   : > { %v1607_v50 = vmax.f32 %v1605_v46, %v1606_v48  ;;  %v1187_v48 = vpack.c.bf16 %v3132_v38, %v3132_v38 }
 0x393   : > { %v1614_v51 = vmax.f32 %v1612_v47, %v1613_v49  ;;  %v3135_v47 = vpop.permute.xlu0 %3134 }
 0x394   : > { %v1621_v52 = vsub.f32 %v1507_v22, %v1607_v50 }
 0x395   : > { %v3165_v53 = vpop.eup %3164  ;;  %v1622_v54 = vsub.f32 %v1553_v23, %v1614_v51 }
 0x396   : > { %v3557_v55 = vpop.eup %3166  ;;  %v1653_v56 = vsel %vm1190_vm3, %v3165_v53, 0.0  ;;  %v1635_v57 = vmul.f32 1.442695, %v1621_v52 }
 0x397   : > { %v1654_v58 = vrot.slane %v1653_v56, 4  ;;  %v1660_v59 = vsel %vm1190_vm3, %v3557_v55, 0.0  ;;  %v1637_v60 = vmul.f32 1.442695, %v1622_v54  ;;  %v3136_v54 = vunpack.i.l.bf16 %v3135_v47 }
 0x398   : > { %v1661_v61 = vrot.slane %v1660_v59, 4  ;;  %3172 = vpow2.f32 %v1635_v57  ;;  %v3137_v57 = vunpack.i.h.bf16 %v3135_v47 }
 0x399   : > { %v1655_v62 = vadd.f32 %v1654_v58, %v1653_v56  ;;  %3174 = vpow2.f32 %v1637_v60  ;;  %v1908_v56 = vsel %vm1722_vm4, %v1186_v44, 0 }
 0x39a   : > { %v1662_v63 = vadd.f32 %v1661_v61, %v1660_v59  ;;  %v1188_v59 = vpack.c.bf16 %v3136_v54, %v3136_v54  ;;  %v1189_v61 = vpack.c.bf16 %v3137_v57, %v3137_v57  ;;  %v2814_v54 = vld [vmem:[%s827_s5] ss:$0 sm:$0xff] }
 0x39b   : > { %v1656_v0 = vrot.slane %v1655_v62, 2 }
 0x39c   : > { %v1663_v1 = vrot.slane %v1662_v63, 2 }
 0x39d   : > { %v3562_v2 = vpop.eup %3168  ;;  %v1657_v3 = vadd.f32 %v1656_v0, %v1655_v62 }
 0x39e   : > { %v3564_v4 = vpop.eup %3170  ;;  %v1664_v5 = vadd.f32 %v1663_v1, %v1662_v63  ;;  %v1667_v6 = vsel %vm1190_vm3, %v3562_v2, 0.0  ;;  %v2000_v1 = vsel %vm1722_vm4, %v1188_v59, 0 }
 0x39f   : > { %v1658_v7 = vrot.slane %v1657_v3, 1  ;;  %v1668_v8 = vrot.slane %v1667_v6, 4  ;;  %v1674_v9 = vsel %vm1190_vm3, %v3564_v4, 0.0 }
 0x3a0   : > { %v1665_v10 = vrot.slane %v1664_v5, 1  ;;  %v1675_v11 = vrot.slane %v1674_v9, 4 }
 0x3a1   : > { %v1659_v12 = vadd.f32 %v1658_v7, %v1657_v3  ;;  %v1669_v13 = vadd.f32 %v1668_v8, %v1667_v6  ;;  %v2046_v3 = vsel %vm1722_vm4, %v1189_v61, 0 }
 0x3a2   : > { %v1666_v14 = vadd.f32 %v1665_v10, %v1664_v5  ;;  %v1676_v15 = vadd.f32 %v1675_v11, %v1674_v9 }
 0x3a3   : > { %3176 = vrcp.f32 %v1659_v12  ;;  %v1670_v16 = vrot.slane %v1669_v13, 2 }
 0x3a4   : > { %3178 = vrcp.f32 %v1666_v14  ;;  %v1677_v17 = vrot.slane %v1676_v15, 2 }
 0x3a5   : > { %v3570_v19 = vpop.eup %3172  ;;  %v1671_v20 = vadd.f32 %v1670_v16, %v1669_v13 }
 0x3a6   : > { %v3572_v21 = vpop.eup %3174  ;;  %v1678_v22 = vadd.f32 %v1677_v17, %v1676_v15  ;;  %v1681_v23 = vsel %vm1190_vm3, %v3570_v19, 0.0 }
 0x3a7   : > { %v1672_v24 = vrot.slane %v1671_v20, 1  ;;  %v1682_v25 = vrot.slane %v1681_v23, 4  ;;  %v1688_v26 = vsel %vm1190_vm3, %v3572_v21, 0.0 }
 0x3a8   : > { %v1679_v27 = vrot.slane %v1678_v22, 1  ;;  %v1689_v28 = vrot.slane %v1688_v26, 4 }
 0x3a9   : > { %v1673_v29 = vadd.f32 %v1672_v24, %v1671_v20  ;;  %v1683_v30 = vadd.f32 %v1682_v25, %v1681_v23  ;;  %v3144_v24 = vld [vmem:[%s3403_s22 + $0x8] sm:$0xff]  }
 0x3aa   : > { %v1680_v32 = vadd.f32 %v1679_v27, %v1678_v22  ;;  %v1690_v33 = vadd.f32 %v1689_v28, %v1688_v26  ;;  %v3145_v27 = vld [vmem:[%s3403_s22] sm:$0xff]  }
 0x3ab   : > { %3180 = vrcp.f32 %v1673_v29  ;;  %v1684_v34 = vrot.slane %v1683_v30, 2 }
 0x3ac   : > { %3182 = vrcp.f32 %v1680_v32  ;;  %v1691_v35 = vrot.slane %v1690_v33, 2 }
 0x3ad   : > { %v1685_v37 = vadd.f32 %v1684_v34, %v1683_v30 }
 0x3ae   : > { %v1692_v39 = vadd.f32 %v1691_v35, %v1690_v33 }
 0x3af   : > { %v1686_v40 = vrot.slane %v1685_v37, 1 }
 0x3b0   : > { %v3177_v41 = vpop.eup %3176  ;;  %v1693_v42 = vrot.slane %v1692_v39, 1 }
 0x3b1   : > { %v3179_v43 = vpop.eup %3178  ;;  %v1687_v45 = vadd.f32 %v1686_v40, %v1685_v37  ;;  %v1705_v46 = vmul.f32 %v3177_v41, %v3165_v53  ;;  %v1954_v53 = vsel %vm1722_vm4, %v1187_v48, 0 }
 0x3b2   : > { %v1694_v49 = vadd.f32 %v1693_v42, %v1692_v39  ;;  %v1706_v50 = vmul.f32 %v3179_v43, %v3557_v55 }
 0x3b3   : > { %3184 = vrcp.f32 %v1687_v45  ;;  %v1713_v51 = vpack.c.bf16 %v1705_v46, %v1705_v46 }
 0x3b4   : > { %3186 = vrcp.f32 %v1694_v49  ;;  %v1714_v52 = vpack.c.bf16 %v1706_v50, %v1706_v50 }
 0x3b5   : > { %2989 = vmatmul.mubr.msk.bf16.vlgmr.msra.gmra.mxu1 %vm1190_vm3, %v1713_v51 }
 0x3b6   : > { %2995 = vmatmul.mubr.msk.bf16.vlgmr.msra.gmra.mxu0 %vm1190_vm3, %v1714_v52  ;;  %2999 = vmatpush3.bf16.msra.mxu1 %v1908_v56 }
 0x3b7   : > { %3005 = vmatpush3.bf16.msra.mxu0 %v1954_v53  ;;  %3000 = vmatprep.mubr.msk.bf16.mxu1 %vm3229_vm2, %v3228_v18 }
 0x3b8   : > { %v3181_v55 = vpop.eup %3180  ;;  %3006 = vmatprep.mubr.msk.bf16.mxu0 %vm3229_vm2, %v3228_v18  ;;  %3010 = vmatprep.subr.bf16.mxu1 %v3228_v18 }
 0x3b9   : > { %v3183_v58 = vpop.eup %3182  ;;  %3016 = vmatprep.subr.bf16.mxu0 %v3228_v18  ;;  %v1707_v60 = vmul.f32 %v3181_v55, %v3562_v2  ;;  %v3196_v55 = vld [vmem:[#allocation2] sm:$0xff] }
 0x3ba   : > { %v1708_v62 = vmul.f32 %v3183_v58, %v3564_v4 }
 0x3bb   : > { %v1715_v63 = vpack.c.bf16 %v1707_v60, %v1707_v60 }
 0x3bc   : > { %v1716_v0 = vpack.c.bf16 %v1708_v62, %v1708_v62 }
 0x3bd   : > { %3001 = vmatmul.mubr.msk.bf16.vlgmr.msra.gmra.mxu1 %vm1190_vm3, %v1715_v63  ;;  %v3197_v63 = vld [vmem:[#allocation2 + $0x8] sm:$0xff] }
 0x3be   : > { %3007 = vmatmul.mubr.msk.bf16.vlgmr.msra.gmra.mxu0 %vm1190_vm3, %v1716_v0  ;;  %3011 = vmatpush3.bf16.msra.mxu1 %v2000_v1 }
 0x3bf   : > { %3017 = vmatpush3.bf16.msra.mxu0 %v2046_v3  ;;  %3012 = vmatprep.mubr.msk.bf16.mxu1 %vm3229_vm2, %v3228_v18 }
 0x3c0   : > { %v3185_v5 = vpop.eup %3184  ;;  %3018 = vmatprep.mubr.msk.bf16.mxu0 %vm3229_vm2, %v3228_v18  ;;  %3022 = vmatprep.subr.bf16.mxu1 %v3228_v18 }
 0x3c1   : > { %v3187_v2 = vpop.eup %3186  ;;  %v1709_v4 = vmul.f32 %v3185_v5, %v3570_v19  ;;  %3030 = vmatprep.subr.bf16.mxu0 %v3228_v18 }
 0x3c2   : > { %v1710_v6 = vmul.f32 %v3187_v2, %v3572_v21 }
 0x3c3   : > { %v1717_v7 = vpack.c.bf16 %v1709_v4, %v1709_v4 }
 0x3c4   : > { %v1718_v8 = vpack.c.bf16 %v1710_v6, %v1710_v6 }
 0x3c5   : > { %3013 = vmatmul.mubr.msk.bf16.vlgmr.msra.gmra.mxu1 %vm1190_vm3, %v1717_v7 }
 0x3c6   : > { %3019 = vmatmul.mubr.msk.bf16.vlgmr.msra.gmra.mxu0 %vm1190_vm3, %v1718_v8  ;;  %3026 = vmatprep.mubr.msk.bf16.mxu1 %vm3229_vm2, %v3228_v18 }
 0x3c7   : > { %3034 = vmatprep.mubr.msk.bf16.mxu0 %vm3229_vm2, %v3228_v18  ;;  %3023 = vmatpush3.bf16.msra.mxu1 %v3144_v24 }
 0x3c8   : > { %3024 = vmatprep.subr.bf16.mxu1 %v3228_v18 }
 0x3cb   : > { %3025 = vmatpush3.bf16.msra.mxu1 %v3145_v27 }
 0x3cc   : > { %3038 = vmatprep.subr.bf16.mxu1 %v3228_v18 }
 0x3fa   : > { %v1760_v9 = vpop.f32.mrf.mxu1 }
 0x3fb   : > { %2088 = vst.msk [vmem:[#allocation3] sm:$0xff] %vm1190_vm3, %v1760_v9 }
 0x3fc   : > { %v2978_v10 = vpop.f32.mrf.mxu1 }
 0x3fe   : > { %v1763_v11 = vpop.f32.mrf.mxu1  ;;  %v1806_v12 = vpop.f32.mrf.mxu0 }
 0x3ff   : > { %2089 = vst.msk [vmem:[#allocation3 + $0x8] sm:$0xff] %vm1190_vm3, %v1806_v12  ;;  %v3146_v12 = vld [vmem:[%s3412_s25 + $0x8] sm:$0xff]  }
 0x400   : > { %v2979_v13 = vpop.f32.mrf.mxu1  ;;  %v2984_v14 = vpop.f32.mrf.mxu0  ;;  %3031 = vmatpush3.bf16.msra.mxu0 %v3146_v12 }
 0x401   : > { %v3147_v13 = vld [vmem:[%s3412_s25] sm:$0xff]   ;;  %3032 = vmatprep.subr.bf16.mxu0 %v3228_v18  ;;  %v3148_v14 = vld [vmem:[%s3422_s20 + $0x18] sm:$0xff]   ;;  %s3768_s25 = sld [smem:[#allocation19_spill]] (!%p2828_p6) }
 0x402   : > { %v1809_v15 = vpop.f32.mrf.mxu0 }
 0x404   : > { %v2985_v16 = vpop.f32.mrf.mxu0  ;;  %3033 = vmatpush3.bf16.msra.mxu0 %v3147_v13 }
 0x475   : > { %v1852_v17 = vpop.f32.mrf.mxu1 }
 0x476   : > { %v1898_v19 = vpop.f32.mrf.mxu0  ;;  %2091 = vrot.lane.b32.xlu1 %v1852_v17, %s3233_s19 }
 0x477   : > { %2097 = vrot.lane.b32.xlu0 %v1898_v19, %s3233_s19  ;;  %v2990_v20 = vpop.f32.mrf.mxu1 }
 0x478   : > { %v2996_v21 = vpop.f32.mrf.mxu0 }
 0x479   : > { %v1855_v22 = vpop.f32.mrf.mxu1 }
 0x47a   : > { %v1901_v23 = vpop.f32.mrf.mxu0 }
 0x47b   : > { %v2991_v25 = vpop.f32.mrf.mxu1 }
 0x47c   : > { %v2997_v26 = vpop.f32.mrf.mxu0 }
 0x47d   : > { %v1944_v28 = vpop.f32.mrf.mxu1  ;;  %v3633_v26 = vld [vmem:[%s3364_s24] ss:$0 sm:$0xff] }
 0x47e   : > { %v1990_v29 = vpop.f32.mrf.mxu0  ;;  %2102 = vrot.lane.b32.xlu1 %v1944_v28, %s3234_s23 }
 0x47f   : > { %2108 = vrot.lane.b32.xlu0 %v1990_v29, %s3234_s23  ;;  %v3002_v30 = vpop.f32.mrf.mxu1  ;;  %v3638_v29 = vld [vmem:[%s3760_s9] ss:$0 sm:$0xff]  ;;  %s3766_s23 = sld [smem:[#allocation16_spill]] (!%p2828_p6) }
 0x480   : > { %v3008_v31 = vpop.f32.mrf.mxu0 }
 0x481   : > { %v1947_v32 = vpop.f32.mrf.mxu1 }
 0x482   : > { %v1993_v33 = vpop.f32.mrf.mxu0 }
 0x483   : > { %v3003_v34 = vpop.f32.mrf.mxu1  ;;  %v3149_v33 = vld [vmem:[%s3422_s20 + $0x10] sm:$0xff]  }
 0x484   : > { %v3009_v35 = vpop.f32.mrf.mxu0  ;;  %v3150_v34 = vld [vmem:[%s3422_s20 + $0x8] sm:$0xff]  }
 0x485   : > { %v2036_v36 = vpop.f32.mrf.mxu1  ;;  %v3151_v35 = vld [vmem:[%s3422_s20] sm:$0xff]  }
 0x486   : > { %v2082_v37 = vpop.f32.mrf.mxu0  ;;  %2113 = vrot.lane.b32.xlu1 %v2036_v36, %s3235_s27  ;;  %v2818_v36 = vld [vmem:[%s835_s7] ss:$0 sm:$0xff] }
 0x487   : > { %2119 = vrot.lane.b32.xlu0 %v2082_v37, %s3235_s27  ;;  %v3014_v38 = vpop.f32.mrf.mxu1 }
 0x488   : > { %v3020_v39 = vpop.f32.mrf.mxu0 }
 0x489   : > { %v2039_v40 = vpop.f32.mrf.mxu1 }
 0x48a   : > { %v2085_v41 = vpop.f32.mrf.mxu0 }
 0x48b   : > { %v3015_v42 = vpop.f32.mrf.mxu1 }
 0x48c   : > { %v3021_v43 = vpop.f32.mrf.mxu0 }
 0x4e8   : > { %v2092_v44 = vpop.permute.xlu1 %2091 }
 0x4e9   : > { %2095 = vst.msk [vmem:[#allocation3] sm:$0xff] %vm2094_vm5, %v2092_v44  ;;  %v2098_v45 = vpop.permute.xlu0 %2097 }
 0x4ea   : > { %2100 = vst.msk [vmem:[#allocation3 + $0x8] sm:$0xff] %vm2094_vm5, %v2098_v45 }
 0x4f0   : > { %v2103_v46 = vpop.permute.xlu1 %2102 }
 0x4f1   : > { %2106 = vst.msk [vmem:[#allocation3] sm:$0xff] %vm2105_vm6, %v2103_v46  ;;  %v2109_v47 = vpop.permute.xlu0 %2108 }
 0x4f2   : > { %2111 = vst.msk [vmem:[#allocation3 + $0x8] sm:$0xff] %vm2105_vm6, %v2109_v47 }
 0x4f8   : > { %v2114_v48 = vpop.permute.xlu1 %2113 }
 0x4f9   : > { %2117 = vst.msk [vmem:[#allocation3] sm:$0xff] %vm2116_vm7, %v2114_v48  ;;  %v2120_v49 = vpop.permute.xlu0 %2119 }
 0x4fa   : > { %2122 = vst.msk [vmem:[#allocation3 + $0x8] sm:$0xff] %vm2116_vm7, %v2120_v49 }
 0x500   : > { %v2123_v50 = vld [vmem:[#allocation3] sm:$0xff] }
 0x501   : > { %v2124_v51 = vld [vmem:[#allocation3 + $0x8] sm:$0xff] }
 0x502   : > { %v2125_v52 = vpack.c.bf16 %v2124_v51, %v2123_v50 }
 0x504   : > { %3027 = vmatmul.mubr.msk.bf16.vlgmr.msra.gmra.mxu1 %vm864_vm1, %v2125_v52 }
 0x505   : > { %3046 = vmatprep.mubr.msk.bf16.mxu1 %vm3229_vm2, %v3228_v18  ;;  %3039 = vmatpush3.bf16.msra.mxu1 %v3148_v14 }
 0x506   : > { %3040 = vmatprep.subr.bf16.mxu1 %v3228_v18 }
 0x509   : > { %3041 = vmatpush3.bf16.msra.mxu1 %v3149_v33 }
 0x50a   : > { %3042 = vmatprep.subr.bf16.mxu1 %v3228_v18 }
 0x50d   : > { %3043 = vmatpush3.bf16.msra.mxu1 %v3150_v34 }
 0x50e   : > { %3044 = vmatprep.subr.bf16.mxu1 %v3228_v18  ;;  %v2822_v18 = vld [vmem:[%s843_s16] ss:$0 sm:$0xff] }
 0x511   : > { %3045 = vmatpush3.bf16.msra.mxu1 %v3151_v35 }
 0x5c4   : > { %v2186_v56 = vpop.f32.mrf.mxu1 }
 0x5c5   : > { %v2187_v57 = vadd.f32 %v2814_v54, %v2186_v56 }
 0x5c6   : > { %v3028_v53 = vpop.f32.mrf.mxu1 }
 0x5c7   : > { %v2193_v58 = vadd.f32 %v3196_v55, %v2187_v57 }
 0x5c8   : > { %v2189_v59 = vpop.f32.mrf.mxu1 }
 0x5c9   : > { %v2190_v60 = vadd.f32 %v2814_v54, %v2189_v59  ;;  %v2195_v61 = vsel %vm864_vm1, %v2193_v58, 0.0 }
 0x5ca   : > { %2196 = vadd.xlane.f32.xlu1 %v2195_v61  ;;  %v3029_v62 = vpop.f32.mrf.mxu1 }
 0x5cb   : > { %v2194_v0 = vadd.f32 %v3197_v63, %v2190_v60 }
 0x5cd   : > { %v2198_v1 = vsel %vm864_vm1, %v2194_v0, 0.0 }
 0x5ce   : > { %2199 = vadd.xlane.f32.xlu0 %v2198_v1 }
 0x653   : > { %v2197_v3 = vpop.xlane.xlu1 %2196 }
 0x654   : > { %v2201_v5 = vmul.f32 0.03125, %v2197_v3 }
 0x656   : > { %v2203_v2 = vsub.f32 %v2193_v58, %v2201_v5 }
 0x657   : > { %v2200_v4 = vpop.xlane.xlu0 %2199 }
 0x658   : > { %v2202_v6 = vmul.f32 0.03125, %v2200_v4  ;;  %v2205_v7 = vmul.f32 %v2203_v2, %v2203_v2 }
 0x65a   : > { %v2204_v8 = vsub.f32 %v2194_v0, %v2202_v6  ;;  %v2207_v9 = vsel %vm864_vm1, %v2205_v7, 0.0 }
 0x65b   : > { %2208 = vadd.xlane.f32.xlu0 %v2207_v9 }
 0x65c   : > { %v2206_v10 = vmul.f32 %v2204_v8, %v2204_v8 }
 0x65e   : > { %v2210_v11 = vsel %vm864_vm1, %v2206_v10, 0.0 }
 0x65f   : > { %2211 = vadd.xlane.f32.xlu0 %v2210_v11 }
 0x6e4   : > { %v2209_v15 = vpop.xlane.xlu0 %2208 }
 0x6e5   : > { %v2213_v16 = vmul.f32 0.03125, %v2209_v15 }
 0x6e7   : > { %v2215_v17 = vadd.f32 1e-05, %v2213_v16 }
 0x6e8   : > { %v2212_v19 = vpop.xlane.xlu0 %2211 }
 0x6e9   : > { %3188 = vrsqrt.f32 %v2215_v17  ;;  %v2214_v20 = vmul.f32 0.03125, %v2212_v19 }
 0x6eb   : > { %v2216_v21 = vadd.f32 1e-05, %v2214_v20 }
 0x6ed   : > { %3190 = vrsqrt.f32 %v2216_v21 }
 0x6f6   : > { %v3189_v22 = vpop.eup %3188 }
 0x6f7   : > { %v2219_v23 = vmul.f32 %v3189_v22, %v2203_v2 }
 0x6f9   : > { %v2221_v27 = vmul.f32 %v3633_v26, %v2219_v23 }
 0x6fa   : > { %v3191_v24 = vpop.eup %3190 }
 0x6fb   : > { %v2220_v25 = vmul.f32 %v3191_v24, %v2204_v8  ;;  %v2223_v30 = vadd.f32 %v3638_v29, %v2221_v27 }
 0x6fd   : > { %v2222_v28 = vmul.f32 %v3633_v26, %v2220_v25 }
 0x6ff   : > { %v2224_v31 = vadd.f32 %v3638_v29, %v2222_v28 }
 0x701   : > { %v2225_v32 = vpack.c.bf16 %v2224_v31, %v2223_v30 }
 0x703   : > { %3035 = vmatmul.mubr.msk.bf16.vlgmr.msra.gmra.mxu0 %vm864_vm1, %v2225_v32 }
 0x7c3   : > { %v2286_v37 = vpop.f32.mrf.mxu0 }
 0x7c4   : > { %v2287_v39 = vadd.f32 %v2818_v36, %v2286_v37 }
 0x7c5   : > { %v3036_v38 = vpop.f32.mrf.mxu0 }
 0x7c6   : > { %v2293_v43 = vmax.f32 %v2287_v39, 0.0 }
 0x7c7   : > { %v2289_v40 = vpop.f32.mrf.mxu0 }
 0x7c8   : > { %v2290_v41 = vadd.f32 %v2818_v36, %v2289_v40 }
 0x7c9   : > { %v3037_v42 = vpop.f32.mrf.mxu0 }
 0x7ca   : > { %v2294_v44 = vmax.f32 %v2290_v41, 0.0 }
 0x7cc   : > { %v2295_v45 = vpack.c.bf16 %v2294_v44, %v2293_v43 }
 0x7ce   : > { %3047 = vmatmul.mubr.msk.bf16.vlgmr.msra.gmra.mxu1 %vm2335_vm8, %v2295_v45 }
 0x88e   : > { %v2373_v46 = vpop.f32.mrf.mxu1 }
 0x88f   : > { %v2374_v47 = vadd.f32 %v2822_v18, %v2373_v46 }
 0x890   : > { %v3048_v48 = vpop.f32.mrf.mxu1 }
 0x891   : > { %v2380_v49 = vadd.f32 %v2374_v47, %v2223_v30 }
 0x892   : > { %v2376_v50 = vpop.f32.mrf.mxu1 }
 0x893   : > { %v2377_v51 = vadd.f32 %v2822_v18, %v2376_v50  ;;  %v2382_v52 = vsel %vm864_vm1, %v2380_v49, 0.0 }
 0x894   : > { %2383 = vadd.xlane.f32.xlu1 %v2382_v52  ;;  %v3049_v54 = vpop.f32.mrf.mxu1 }
 0x895   : > { %v2381_v56 = vadd.f32 %v2377_v51, %v2224_v31 }
 0x897   : > { %v2385_v57 = vsel %vm864_vm1, %v2381_v56, 0.0 }
 0x898   : > { %2386 = vadd.xlane.f32.xlu0 %v2385_v57 }
 0x91d   : > { %v2384_v53 = vpop.xlane.xlu1 %2383 }
 0x91e   : > { %v2388_v55 = vmul.f32 0.03125, %v2384_v53 }
 0x920   : > { %v2390_v58 = vsub.f32 %v2380_v49, %v2388_v55 }
 0x921   : > { %v2387_v59 = vpop.xlane.xlu0 %2386 }
 0x922   : > { %v2389_v60 = vmul.f32 0.03125, %v2387_v59  ;;  %v2392_v61 = vmul.f32 %v2390_v58, %v2390_v58 }
 0x924   : > { %v2391_v62 = vsub.f32 %v2381_v56, %v2389_v60  ;;  %v2394_v63 = vsel %vm864_vm1, %v2392_v61, 0.0 }
 0x925   : > { %2395 = vadd.xlane.f32.xlu1 %v2394_v63 }
 0x926   : > { %v2393_v0 = vmul.f32 %v2391_v62, %v2391_v62 }
 0x928   : > { %v2397_v1 = vsel %vm864_vm1, %v2393_v0, 0.0 }
 0x929   : > { %2398 = vadd.xlane.f32.xlu0 %v2397_v1 }
 0x9ae   : > { %v2396_v3 = vpop.xlane.xlu1 %2395 }
 0x9af   : > { %v2400_v5 = vmul.f32 0.03125, %v2396_v3 }
 0x9b1   : > { %v2402_v2 = vadd.f32 1e-05, %v2400_v5 }
 0x9b2   : > { %v2399_v4 = vpop.xlane.xlu0 %2398 }
 0x9b3   : > { %3192 = vrsqrt.f32 %v2402_v2  ;;  %v2401_v6 = vmul.f32 0.03125, %v2399_v4 }
 0x9b5   : > { %v2403_v7 = vadd.f32 1e-05, %v2401_v6 }
 0x9b7   : > { %3194 = vrsqrt.f32 %v2403_v7 }
 0x9c0   : > { %v3193_v8 = vpop.eup %3192 }
 0x9c1   : > { %v2406_v9 = vmul.f32 %v3193_v8, %v2390_v58 }
 0x9c3   : > { %v2408_v10 = vmul.f32 %v3633_v26, %v2406_v9 }
 0x9c4   : > { %v3195_v11 = vpop.eup %3194 }
 0x9c5   : > { %v2410_v12 = vadd.f32 %v3638_v29, %v2408_v10  ;;  %v2407_v13 = vmul.f32 %v3195_v11, %v2391_v62 }
 0x9c7   : > { %2412 = vst.msk [vmem:[#allocation2] sm:$0xff] %vm864_vm1, %v2410_v12  ;;  %v2409_v14 = vmul.f32 %v3633_v26, %v2407_v13  ;;  %2417 = sbr.rel (%p2828_p6) target bundleno = 3018 (0xbca), region = 104 }
 0x9c9   : > { %v2411_v15 = vadd.f32 %v3638_v29, %v2409_v14 }
 0x9cb   : > { %2413 = vst.msk [vmem:[#allocation2 + $0x8] sm:$0xff] %vm864_vm1, %v2411_v15 }
 0x9cc   : > { %v2420_v16 = vsel %vm864_vm1, %v2410_v12, 0.0  ;;  %v2423_v17 = vsel %vm864_vm1, %v2411_v15, 0.0  ;;  %v2465_v29 = vld [vmem:[%s3764_s1 + $0x18] sm:$0xff]  ;;  %v2464_v30 = vld [vmem:[%s3764_s1 + $0x10] sm:$0xff]  ;;  %v2463_v31 = vld [vmem:[%s3764_s1 + $0x8] sm:$0xff]  ;;  %vm2554_vm9 = vcmask 31744  }
 0x9cd   : > { %2421 = vadd.xlane.f32.xlu0 %v2420_v16  ;;  %3050 = vmatprep.subr.mxu0 %v2465_v29  ;;  %v2462_v32 = vld [vmem:[%s3764_s1] sm:$0xff] }
 0x9ce   : > { %3051 = vmatpush3.msra.mxu0 %v2465_v29  ;;  %v2829_v40 = vld [vmem:[%s3765_s17] ss:$0 sm:$0xff] }
 0x9cf   : > { %3052 = vmatprep.subr.mxu0 %v2464_v30  ;;  %v2830_v42 = vld [vmem:[%s3766_s23] ss:$0 sm:$0xff] }
 0x9d0   : > { %3053 = vmatpush3.msra.mxu0 %v2464_v30  ;;  %v2831_v48 = vld [vmem:[%s3767_s30] ss:$0 sm:$0xff] }
 0x9d1   : > { %2424 = vadd.xlane.f32.xlu0 %v2423_v17  ;;  %3054 = vmatprep.subr.mxu0 %v2463_v31 }
 0x9d2   : > { %3055 = vmatpush3.msra.mxu0 %v2463_v31 }
 0x9d3   : > { %3056 = vmatprep.subr.mxu0 %v2462_v32 }
 0x9d4   : > { %3057 = vmatpush3.msra.mxu0 %v2462_v32 }
 0xa56   : > { %v2422_v19 = vpop.xlane.xlu0 %2421 }
 0xa57   : > { %v2426_v20 = vmul.f32 0.03125, %v2422_v19 }
 0xa59   : > { %v2428_v21 = vsub.f32 %v2410_v12, %v2426_v20 }
 0xa5a   : > { %v2425_v22 = vpop.xlane.xlu0 %2424 }
 0xa5b   : > { %v2427_v23 = vmul.f32 0.03125, %v2425_v22  ;;  %v2430_v24 = vmul.f32 %v2428_v21, %v2428_v21 }
 0xa5d   : > { %v2429_v25 = vsub.f32 %v2411_v15, %v2427_v23  ;;  %v2432_v26 = vsel %vm864_vm1, %v2430_v24, 0.0 }
 0xa5e   : > { %2433 = vadd.xlane.f32.xlu1 %v2432_v26 }
 0xa5f   : > { %v2431_v27 = vmul.f32 %v2429_v25, %v2429_v25 }
 0xa61   : > { %v2435_v28 = vsel %vm864_vm1, %v2431_v27, 0.0 }
 0xa62   : > { %2436 = vadd.xlane.f32.xlu1 %v2435_v28 }
 0xae7   : > { %v2434_v33 = vpop.xlane.xlu1 %2433 }
 0xae8   : > { %v2438_v34 = vmul.f32 0.03125, %v2434_v33 }
 0xaea   : > { %v2440_v35 = vadd.f32 1e-05, %v2438_v34 }
 0xaeb   : > { %v2437_v36 = vpop.xlane.xlu1 %2436 }
 0xaec   : > { %3200 = vrsqrt.f32 %v2440_v35  ;;  %v2439_v37 = vmul.f32 0.03125, %v2437_v36 }
 0xaee   : > { %v2441_v38 = vadd.f32 1e-05, %v2439_v37 }
 0xaf0   : > { %3202 = vrsqrt.f32 %v2441_v38 }
 0xaf9   : > { %v3201_v39 = vpop.eup %3200 }
 0xafa   : > { %v2444_v41 = vmul.f32 %v3201_v39, %v2428_v21 }
 0xafc   : > { %v2452_v43 = vmul.f32 %v2829_v40, %v2444_v41 }
 0xafd   : > { %v3203_v44 = vpop.eup %3202 }
 0xafe   : > { %v2445_v45 = vmul.f32 %v3203_v44, %v2429_v25  ;;  %v2460_v18 = vadd.f32 %v2830_v42, %v2452_v43 }
 0xb00   : > { %v2453_v46 = vmul.f32 %v2829_v40, %v2445_v45  ;;  %3058 = vmatprep.mubr.msk.f32.mxu0 %vm864_vm1, %v2460_v18 }
 0xb02   : > { %v2461_v47 = vadd.f32 %v2830_v42, %v2453_v46 }
 0xb04   : > { %3059 = vmatmul.mubr.msk.f32.vlgmr.msra.gmra.mxu0 %vm864_vm1, %v2461_v47 }
 0xbc4   : > { %v3060_v49 = vpop.f32.mrf.mxu0 }
 0xbc5   : > { %v2551_v50 = vadd.f32 %v3060_v49, %v2831_v48 }
 0xbc6   : > { %v2545_v51 = vpop.f32.mrf.mxu0 }
 0xbc7   : > { %2556 = vst.msk [vmem:[%s3768_s25 + $0x8] sm:$0xff] %vm2554_vm9, %v2551_v50  ;;  %v2546_v52 = vadd.f32 %v2831_v48, %v2545_v51 }
 0xbc9   : > { %2555 = vst.msk [vmem:[%s3768_s25] sm:$0xff] %vm2554_vm9, %v2546_v52 }
 0xbca PF: > { %s3769_s0 = sld [smem:[#allocation5_spill]] }
 0xbcb   : > { %s3771_s30 = sld [smem:[#allocation6_spill]] }
 0xbd0   : > { %s29_s20 = sadd.s32 1, %s3769_s0   ;;  %s3770_s0 = sld [smem:[#allocation4_spill]] }
 0xbd1   : > { %p26_p7 = scmp.ge.s32.totalorder %s29_s20, 4  }
 0xbd3   :  { %28 = sbr.rel (!%p26_p7) target bundleno = 13 (0xd), region = 176 }

</bundles_post_ra>
